<compile_context>
chip_gen: v7x
topology: tpu7x:2x2x1
jax: 0.10.0
libtpu: 0.0.40
codegen_flags: <defaults>
</compile_context>

<pallas_src>
import functools

import jax
import jax.numpy as jnp
from jax.experimental import pallas as pl
from jax.experimental.pallas import tpu as pltpu


CFG = dict(vocab=100, hidden=32, heads=4, layers=2, intermediate=64,
           max_pos=64, num_labels=3, pad_id=1)

LANE = 128


def _ceil_to(x, m):
    return ((x + m - 1) // m) * m


def _padded_dims(cfg):
    H, nh, I = cfg["hidden"], cfg["heads"], cfg["intermediate"]
    Hp = _ceil_to(H, LANE)
    Dp = _ceil_to(H // nh, LANE)
    Ip = _ceil_to(I, LANE)
    Np = _ceil_to(cfg["num_labels"], LANE)
    return Hp, Dp, Ip, Np


# ----------------------------------------------------------------------------
# In-kernel helpers (pure jnp, traced inside the Pallas kernel)
# ----------------------------------------------------------------------------

def _layernorm_masked(x, g, b, true_h, lane_mask, eps=1e-5):
    """LayerNorm over the first `true_h` lanes of a lane-padded (S, Hp) tile.

    Padded lanes of x, g, b are zero on entry, so mean is correct from a plain
    sum / true_h; variance needs the lane mask; output stays zero on padding.
    """
    inv_h = jnp.float32(1.0 / true_h)
    mu = jnp.sum(x, axis=-1, keepdims=True) * inv_h
    diff = x - mu
    diff_m = jnp.where(lane_mask, diff, 0.0)
    var = jnp.sum(diff_m * diff_m, axis=-1, keepdims=True) * inv_h
    return diff * jax.lax.rsqrt(var + eps) * g + b


def _gelu(y):
    # TODO(synk): HF Camembert uses exact erf-GELU; tanh approximation used here
    # (no guaranteed Mosaic erf lowering; difference < 1e-3).
    c = jnp.float32(0.7978845608028654)  # sqrt(2/pi)
    return 0.5 * y * (1.0 + jnp.tanh(c * (y + 0.044715 * y * y * y)))


# ----------------------------------------------------------------------------
# The fused kernel: embeddings-LN -> L encoder layers -> classifier
# ----------------------------------------------------------------------------

def _fused_camembert_kernel(emb_ref, bias_ref, embln_ref,
                            wqkv_ref, wo_ref, w1_ref, w2_ref, vec_ref,
                            clsw_ref, clsb_ref,
                            hid_ref, logits_ref,
                            *, S, H, Hp, nh, dh, Dp, I, Ip, n_layers):
    l = pl.program_id(1)                                   # layer (inner axis)

    lane = jax.lax.broadcasted_iota(jnp.int32, (1, Hp), 1)
    hmask = lane < H                                       # real hidden lanes

    # --- l == 0: initialize the VMEM-resident activation from the embeddings.
    @pl.when(l == 0)
    def _init():
        hid_ref[...] = _layernorm_masked(
            emb_ref[...], embln_ref[0:1, :], embln_ref[1:2, :], H, hmask)

    x = hid_ref[...]                                       # (S, Hp) carry
    bias = bias_ref[0]                                     # (1, S) additive mask
    vec = vec_ref[0]                                       # (8, 3*nh*Dp) bias slab

    # Packed QKV projection: one (S,Hp) x (Hp, 3*nh*Dp) matmul, lane-dense.
    qkv = jnp.dot(x, wqkv_ref[0], preferred_element_type=jnp.float32) + vec[0:1, :]

    scale = jnp.float32(1.0 / (dh ** 0.5))
    ctx_heads = []
    # Static head loop (nh=4 toy); all slices are 128-lane aligned views.
    for hh in range(nh):
        q = qkv[:, hh * Dp:(hh + 1) * Dp]                  # (S, Dp)
        k = qkv[:, (nh + hh) * Dp:(nh + hh + 1) * Dp]      # (S, Dp)
        v = qkv[:, (2 * nh + hh) * Dp:(2 * nh + hh + 1) * Dp]
        # q @ k^T without an explicit transpose (contract last dims).
        s = jax.lax.dot_general(q, k, (((1,), (1,)), ((), ())),
                                preferred_element_type=jnp.float32)
        s = s * scale + bias                               # (S,S) + (1,S)
        m = jnp.max(s, axis=-1, keepdims=True)
        p = jnp.exp(s - m)
        p = p * pl.reciprocal(jnp.sum(p, axis=-1, keepdims=True), approx=True)
        ctx_heads.append(jnp.dot(p, v, preferred_element_type=jnp.float32))
    ctx = jnp.concatenate(ctx_heads, axis=-1)              # (S, nh*Dp)

    # Single K = nh*Dp output projection (fills the MXU depth).
    attn = (jnp.dot(ctx, wo_ref[0], preferred_element_type=jnp.float32)
            + vec[1:2, :Hp])
    h1 = _layernorm_masked(attn + x, vec[2:3, :Hp], vec[3:4, :Hp], H, hmask)

    # Feed-forward.
    y = jnp.dot(h1, w1_ref[0], preferred_element_type=jnp.float32) + vec[4:5, :Ip]
    ff = (jnp.dot(_gelu(y), w2_ref[0], preferred_element_type=jnp.float32)
          + vec[5:6, :Hp])
    h2 = _layernorm_masked(ff + h1, vec[6:7, :Hp], vec[7:8, :Hp], H, hmask)

    hid_ref[...] = h2                                      # carry to next layer

    # --- last layer: classifier head fused as epilogue (lane/sublane-dense
    #     store over all S rows; the [CLS] row is sliced out in JAX).
    @pl.when(l == n_layers - 1)
    def _classify():
        logits_ref[...] = (jnp.dot(h2, clsw_ref[...],
                                   preferred_element_type=jnp.float32)
                           + clsb_ref[...])


# ----------------------------------------------------------------------------
# pallas_call wrapper
# ----------------------------------------------------------------------------

def fused_camembert_call(emb, attn_bias, packed, cfg, B, S):
    H, nh, I, L = cfg["hidden"], cfg["heads"], cfg["intermediate"], cfg["layers"]
    dh = H // nh
    Hp, Dp, Ip, Np = _padded_dims(cfg)
    Wq = 3 * nh * Dp

    kernel = functools.partial(_fused_camembert_kernel, S=S, H=H, Hp=Hp, nh=nh,
                               dh=dh, Dp=Dp, I=I, Ip=Ip, n_layers=L)

    def per_layer(shape):
        n = len(shape)
        return pl.BlockSpec((1,) + shape, lambda b, l, _n=n: (l,) + (0,) * _n)

    def invariant(shape):
        n = len(shape)
        return pl.BlockSpec(shape, lambda b, l, _n=n: (0,) * _n)

    row_spec = pl.BlockSpec((S, Hp), lambda b, l: (b, 0))

    hid, logits = pl.pallas_call(
        kernel,
        out_shape=(jax.ShapeDtypeStruct((B * S, Hp), jnp.float32),   # padded last_hidden
                   jax.ShapeDtypeStruct((B * S, Np), jnp.float32)),  # padded per-token logits
        grid=(B, L),                                       # layer axis innermost
        in_specs=[row_spec,                                          # embeddings
                  pl.BlockSpec((1, 1, S), lambda b, l: (b, 0, 0)),   # attention bias
                  invariant((2, Hp)),                                # emb LN gamma/beta
                  per_layer((Hp, Wq)),                               # stacked wqkv
                  per_layer((nh * Dp, Hp)),                          # stacked wo
                  per_layer((Hp, Ip)),                               # stacked w1
                  per_layer((Ip, Hp)),                               # stacked w2
                  per_layer((8, Wq)),                                # bias/LN slab
                  invariant((Hp, Np)),                               # classifier W
                  invariant((1, Np))],                               # classifier b
        out_specs=(row_spec,
                   pl.BlockSpec((S, Np), lambda b, l: (b, 0))),
        compiler_params=pltpu.CompilerParams(
            dimension_semantics=("parallel", "arbitrary")),
    )(emb, attn_bias, packed["emb_ln"],
      packed["wqkv"], packed["wo"], packed["w1"], packed["w2"], packed["vec"],
      packed["cls_w"], packed["cls_b"])
    return hid, logits


# ----------------------------------------------------------------------------
# Parameters: "PyTorch-like" init, then one-time lane-dense packing
# ----------------------------------------------------------------------------

def init_params(key, cfg):
    def nrm(k, shape):
        return 0.02 * jax.random.normal(k, shape, jnp.float32)

    H, I = cfg["hidden"], cfg["intermediate"]
    keys = iter(jax.random.split(key, 4 + 6 * cfg["layers"]))
    params = {
        "word_emb": nrm(next(keys), (cfg["vocab"], H)),
        "pos_emb":  nrm(next(keys), (cfg["max_pos"], H)),
        "type_emb": nrm(next(keys), (1, H)),
        "emb_ln_g": jnp.ones((H,), jnp.float32),
        "emb_ln_b": jnp.zeros((H,), jnp.float32),
        "cls_w": nrm(next(keys), (H, cfg["num_labels"])),
        "cls_b": jnp.zeros((cfg["num_labels"],), jnp.float32),
        "layers": [],
    }
    for _ in range(cfg["layers"]):
        params["layers"].append({
            "wq": nrm(next(keys), (H, H)), "bq": jnp.zeros((H,), jnp.float32),
            "wk": nrm(next(keys), (H, H)), "bk": jnp.zeros((H,), jnp.float32),
            "wv": nrm(next(keys), (H, H)), "bv": jnp.zeros((H,), jnp.float32),
            "wo": nrm(next(keys), (H, H)), "bo": jnp.zeros((H,), jnp.float32),
            "ln1_g": jnp.ones((H,), jnp.float32), "ln1_b": jnp.zeros((H,), jnp.float32),
            "w1": nrm(next(keys), (H, I)), "b1": jnp.zeros((I,), jnp.float32),
            "w2": nrm(next(keys), (I, H)), "b2": jnp.zeros((H,), jnp.float32),
            "ln2_g": jnp.ones((H,), jnp.float32), "ln2_b": jnp.zeros((H,), jnp.float32),
        })
    return params


def pack_params(params, cfg):
    """One-time lane-dense packing: pad H/dh/I/num_labels to 128, stack layers."""
    H, nh, I, L = cfg["hidden"], cfg["heads"], cfg["intermediate"], cfg["layers"]
    dh = H // nh
    Hp, Dp, Ip, Np = _padded_dims(cfg)
    Wq = 3 * nh * Dp

    wqkv = jnp.zeros((L, Hp, Wq), jnp.float32)
    wo = jnp.zeros((L, nh * Dp, Hp), jnp.float32)
    w1 = jnp.zeros((L, Hp, Ip), jnp.float32)
    w2 = jnp.zeros((L, Ip, Hp), jnp.float32)
    vec = jnp.zeros((L, 8, Wq), jnp.float32)

    for li, lp in enumerate(params["layers"]):
        for hh in range(nh):
            sl = slice(hh * dh, (hh + 1) * dh)
            qo, ko, vo = hh * Dp, (nh + hh) * Dp, (2 * nh + hh) * Dp
            wqkv = wqkv.at[li, :H, qo:qo + dh].set(lp["wq"][:, sl])
            wqkv = wqkv.at[li, :H, ko:ko + dh].set(lp["wk"][:, sl])
            wqkv = wqkv.at[li, :H, vo:vo + dh].set(lp["wv"][:, sl])
            wo = wo.at[li, qo:qo + dh, :H].set(lp["wo"][sl, :])
            vec = vec.at[li, 0, qo:qo + dh].set(lp["bq"][sl])
            vec = vec.at[li, 0, ko:ko + dh].set(lp["bk"][sl])
            vec = vec.at[li, 0, vo:vo + dh].set(lp["bv"][sl])
        w1 = w1.at[li, :H, :I].set(lp["w1"])
        w2 = w2.at[li, :I, :H].set(lp["w2"])
        vec = vec.at[li, 1, :H].set(lp["bo"])
        vec = vec.at[li, 2, :H].set(lp["ln1_g"])
        vec = vec.at[li, 3, :H].set(lp["ln1_b"])
        vec = vec.at[li, 4, :I].set(lp["b1"])
        vec = vec.at[li, 5, :H].set(lp["b2"])
        vec = vec.at[li, 6, :H].set(lp["ln2_g"])
        vec = vec.at[li, 7, :H].set(lp["ln2_b"])

    emb_ln = (jnp.zeros((2, Hp), jnp.float32)
              .at[0, :H].set(params["emb_ln_g"])
              .at[1, :H].set(params["emb_ln_b"]))
    cls_w = jnp.zeros((Hp, Np), jnp.float32).at[:H, :cfg["num_labels"]].set(params["cls_w"])
    cls_b = jnp.zeros((1, Np), jnp.float32).at[0, :cfg["num_labels"]].set(params["cls_b"])

    # Pad the embedding tables once so gathers already produce Hp-wide rows.
    word_emb = jnp.zeros((cfg["vocab"], Hp), jnp.float32).at[:, :H].set(params["word_emb"])
    pos_emb = jnp.zeros((cfg["max_pos"], Hp), jnp.float32).at[:, :H].set(params["pos_emb"])
    type_emb = jnp.zeros((1, Hp), jnp.float32).at[:, :H].set(params["type_emb"])

    return dict(wqkv=wqkv, wo=wo, w1=w1, w2=w2, vec=vec, emb_ln=emb_ln,
                cls_w=cls_w, cls_b=cls_b,
                word_emb=word_emb, pos_emb=pos_emb, type_emb=type_emb)


# ----------------------------------------------------------------------------
# Model forward (JAX glue + one fused pallas_call)
# ----------------------------------------------------------------------------

def custom_camembert_forward(packed, input_ids, attention_mask=None, labels=None,
                             cfg=CFG):
    B, S = input_ids.shape
    Hp, _, _, Np = _padded_dims(cfg)
    if attention_mask is None:
        attention_mask = jnp.ones((B, S), jnp.float32)
    pad_id = cfg["pad_id"]

    # Embedding gathers kept in JAX glue (no clean Pallas gather at this size).
    nonpad = (input_ids != pad_id).astype(jnp.int32)
    position_ids = jnp.cumsum(nonpad, axis=1) * nonpad + pad_id   # RoBERTa-style
    emb = (packed["word_emb"][input_ids]
           + packed["pos_emb"][position_ids]
           + packed["type_emb"][0])                               # (B, S, Hp)
    emb = emb.reshape(B * S, Hp)

    # Additive attention bias (f32, so -1e9 is safely "-inf"), computed once.
    attn_bias = ((1.0 - attention_mask.astype(jnp.float32))
                 * jnp.float32(-1e9)).reshape(B, 1, S)

    _, logits_p = fused_camembert_call(emb, attn_bias, packed, cfg, B, S)
    # Classifier was applied to every token for dense stores; keep the [CLS] row.
    logits = logits_p.reshape(B, S, Np)[:, 0, :cfg["num_labels"]]
    # dropout(p=0.1): identity at inference (deterministic forward).

    loss = None
    if labels is not None:
        logp = jax.nn.log_softmax(logits, axis=-1)
        loss = -jnp.mean(jnp.take_along_axis(logp, labels[:, None], axis=1))
        return loss, logits
    return None, logits


# ----------------------------------------------------------------------------
# Main
# ----------------------------------------------------------------------------

if __name__ == "__main__":
    key = jax.random.PRNGKey(0)
    pkey, ikey = jax.random.split(key)

    B, S = 2, 8
    params = init_params(pkey, CFG)
    packed = pack_params(params, CFG)     # one-time lane-dense packing
    input_ids = jax.random.randint(ikey, (B, S), 5, CFG["vocab"], dtype=jnp.int32)
    attention_mask = jnp.ones((B, S), jnp.float32).at[1, S - 1].set(0.0)

    fwd = jax.jit(lambda p, ids, mask: custom_camembert_forward(p, ids, mask, cfg=CFG))
    loss, logits = fwd(packed, input_ids, attention_mask)
    logits = jax.block_until_ready(logits)
    assert loss is None
    assert logits.shape == (B, CFG["num_labels"])
    print("KERNEL_OK")
</pallas_src>

<mosaic_0001>
module attributes {stable_mosaic.version = 11 : i64} {
  func.func @_fused_camembert_kernel(%arg0: i32, %arg1: i32, %arg2: memref<8x128xf32, #tpu.memory_space<vmem>>, %arg3: memref<1x1x8xf32, #tpu.memory_space<vmem>>, %arg4: memref<2x128xf32, #tpu.memory_space<vmem>>, %arg5: memref<1x128x1536xf32, #tpu.memory_space<vmem>>, %arg6: memref<1x512x128xf32, #tpu.memory_space<vmem>>, %arg7: memref<1x128x128xf32, #tpu.memory_space<vmem>>, %arg8: memref<1x128x128xf32, #tpu.memory_space<vmem>>, %arg9: memref<1x8x1536xf32, #tpu.memory_space<vmem>>, %arg10: memref<128x128xf32, #tpu.memory_space<vmem>>, %arg11: memref<1x128xf32, #tpu.memory_space<vmem>>, %arg12: memref<8x128xf32, #tpu.memory_space<vmem>>, %arg13: memref<8x128xf32, #tpu.memory_space<vmem>>) attributes {dimension_semantics = [#tpu.dimension_semantics<parallel>, #tpu.dimension_semantics<arbitrary>], iteration_bounds = array<i64: 2, 2>, scalar_prefetch = 0 : i64, scratch_operands = 0 : i64, tpu.core_type = #tpu.core_type<tc>, window_params = [{transform_indices = @transform_0, window_bounds = array<i64: 8, 128>}, {transform_indices = @transform_1, window_bounds = array<i64: 1, 1, 8>}, {pipeline_mode = #tpu.pipeline_mode<synchronous>, transform_indices = @transform_2, window_bounds = array<i64: 2, 128>}, {transform_indices = @transform_3, window_bounds = array<i64: 1, 128, 1536>}, {transform_indices = @transform_4, window_bounds = array<i64: 1, 512, 128>}, {transform_indices = @transform_5, window_bounds = array<i64: 1, 128, 128>}, {transform_indices = @transform_6, window_bounds = array<i64: 1, 128, 128>}, {transform_indices = @transform_7, window_bounds = array<i64: 1, 8, 1536>}, {pipeline_mode = #tpu.pipeline_mode<synchronous>, transform_indices = @transform_8, window_bounds = array<i64: 128, 128>}, {pipeline_mode = #tpu.pipeline_mode<synchronous>, transform_indices = @transform_9, window_bounds = array<i64: 1, 128>}, {transform_indices = @transform_10, window_bounds = array<i64: 8, 128>}, {transform_indices = @transform_11, window_bounds = array<i64: 8, 128>}]} {
    %0 = tpu.iota {dimensions = array<i32: 1>} : vector<1x128xi32>
    %c32_i32 = arith.constant 32 : i32
    %1 = vector.broadcast %c32_i32 : i32 to vector<1x128xi32>
    %2 = arith.cmpi slt, %0, %1 : vector<1x128xi32>
    %c0_i32 = arith.constant 0 : i32
    %3 = arith.cmpi eq, %arg1, %c0_i32 : i32
    %4 = arith.extui %3 : i1 to i32
    %c0_i32_0 = arith.constant 0 : i32
    %5 = arith.cmpi ne, %4, %c0_i32_0 : i32
    scf.if %5 {
      %c0_62 = arith.constant 0 : index
      %c0_63 = arith.constant 0 : index
      %183 = vector.load %arg2[%c0_62, %c0_63] : memref<8x128xf32, #tpu.memory_space<vmem>>, vector<8x128xf32>
      %c0_64 = arith.constant 0 : index
      %c0_65 = arith.constant 0 : index
      %184 = vector.load %arg4[%c0_64, %c0_65] : memref<2x128xf32, #tpu.memory_space<vmem>>, vector<1x128xf32>
      %c1 = arith.constant 1 : index
      %c0_66 = arith.constant 0 : index
      %185 = vector.load %arg4[%c1, %c0_66] : memref<2x128xf32, #tpu.memory_space<vmem>>, vector<1x128xf32>
      %cst_67 = arith.constant dense<0.000000e+00> : vector<8xf32>
      %186 = vector.multi_reduction <add>, %183, %cst_67 [1] : vector<8x128xf32> to vector<8xf32>
      %187 = vector.shape_cast %186 : vector<8xf32> to vector<8x1xf32>
      %cst_68 = arith.constant 3.125000e-02 : f32
      %188 = vector.broadcast %cst_68 : f32 to vector<8x1xf32>
      %189 = arith.mulf %187, %188 : vector<8x1xf32>
      %190 = vector.broadcast %189 : vector<8x1xf32> to vector<8x128xf32>
      %191 = arith.subf %183, %190 : vector<8x128xf32>
      %cst_69 = arith.constant 0.000000e+00 : f32
      %192 = vector.shape_cast %2 : vector<1x128xi1> to vector<1x128xi1>
      %193 = vector.broadcast %192 : vector<1x128xi1> to vector<8x128xi1>
      %194 = vector.broadcast %cst_69 : f32 to vector<8x128xf32>
      %195 = arith.select %193, %191, %194 : vector<8x128xi1>, vector<8x128xf32>
      %196 = arith.mulf %195, %195 : vector<8x128xf32>
      %cst_70 = arith.constant dense<0.000000e+00> : vector<8xf32>
      %197 = vector.multi_reduction <add>, %196, %cst_70 [1] : vector<8x128xf32> to vector<8xf32>
      %198 = vector.shape_cast %197 : vector<8xf32> to vector<8x1xf32>
      %cst_71 = arith.constant 3.125000e-02 : f32
      %199 = vector.broadcast %cst_71 : f32 to vector<8x1xf32>
      %200 = arith.mulf %198, %199 : vector<8x1xf32>
      %cst_72 = arith.constant 9.99999974E-6 : f32
      %201 = vector.broadcast %cst_72 : f32 to vector<8x1xf32>
      %202 = arith.addf %200, %201 : vector<8x1xf32>
      %203 = math.rsqrt %202 : vector<8x1xf32>
      %204 = vector.broadcast %203 : vector<8x1xf32> to vector<8x128xf32>
      %205 = arith.mulf %191, %204 : vector<8x128xf32>
      %206 = vector.broadcast %184 : vector<1x128xf32> to vector<8x128xf32>
      %207 = arith.mulf %205, %206 : vector<8x128xf32>
      %208 = vector.broadcast %185 : vector<1x128xf32> to vector<8x128xf32>
      %209 = arith.addf %207, %208 : vector<8x128xf32>
      %c0_73 = arith.constant 0 : index
      %c0_74 = arith.constant 0 : index
      %210 = vector.load %arg12[%c0_73, %c0_74] : memref<8x128xf32, #tpu.memory_space<vmem>>, vector<8x128xf32>
      tpu.vector_store %arg12[%c0_73, %c0_74], %209 {strides = array<i32>} : memref<8x128xf32, #tpu.memory_space<vmem>>, vector<8x128xf32>,
    } else {
    }
    %c0 = arith.constant 0 : index
    %c0_1 = arith.constant 0 : index
    %6 = vector.load %arg12[%c0, %c0_1] : memref<8x128xf32, #tpu.memory_space<vmem>>, vector<8x128xf32>
    %c0_2 = arith.constant 0 : index
    %c0_3 = arith.constant 0 : index
    %c0_4 = arith.constant 0 : index
    %7 = vector.load %arg3[%c0_2, %c0_3, %c0_4] : memref<1x1x8xf32, #tpu.memory_space<vmem>>, vector<1x1x8xf32>
    %8 = vector.shape_cast %7 : vector<1x1x8xf32> to vector<1x8xf32>
    %c0_5 = arith.constant 0 : index
    %c0_6 = arith.constant 0 : index
    %c0_7 = arith.constant 0 : index
    %9 = vector.load %arg9[%c0_5, %c0_6, %c0_7] : memref<1x8x1536xf32, #tpu.memory_space<vmem>>, vector<1x8x1536xf32>
    %10 = vector.shape_cast %9 : vector<1x8x1536xf32> to vector<8x1536xf32>
    %c0_8 = arith.constant 0 : index
    %c0_9 = arith.constant 0 : index
    %c0_10 = arith.constant 0 : index
    %11 = vector.load %arg5[%c0_8, %c0_9, %c0_10] : memref<1x128x1536xf32, #tpu.memory_space<vmem>>, vector<1x128x1536xf32>
    %12 = vector.shape_cast %11 : vector<1x128x1536xf32> to vector<128x1536xf32>
    %cst = arith.constant dense<0.000000e+00> : vector<8x1536xf32>
    %13 = tpu.matmul %6, %12, %cst {dimension_numbers = #tpu.dot_dimension_numbers<[1], [0], [0], [1], [0, 0, 1, 1], [], []>} : vector<8x128xf32>, vector<128x1536xf32>, vector<8x1536xf32> -> vector<8x1536xf32>
    %14 = vector.extract_strided_slice %10 {offsets = [0, 0], sizes = [1, 1536], strides = [1, 1]} : vector<8x1536xf32> to vector<1x1536xf32>
    %15 = vector.broadcast %14 : vector<1x1536xf32> to vector<8x1536xf32>
    %16 = arith.addf %13, %15 : vector<8x1536xf32>
    %17 = vector.extract_strided_slice %16 {offsets = [0, 0], sizes = [8, 128], strides = [1, 1]} : vector<8x1536xf32> to vector<8x128xf32>
    %18 = vector.extract_strided_slice %16 {offsets = [0, 512], sizes = [8, 128], strides = [1, 1]} : vector<8x1536xf32> to vector<8x128xf32>
    %19 = vector.extract_strided_slice %16 {offsets = [0, 1024], sizes = [8, 128], strides = [1, 1]} : vector<8x1536xf32> to vector<8x128xf32>
    %cst_11 = arith.constant dense<0.000000e+00> : vector<8x8xf32>
    %20 = tpu.matmul %17, %18, %cst_11 {dimension_numbers = #tpu.dot_dimension_numbers<[1], [1], [0], [0], [0, 0, 1, 0], [], []>} : vector<8x128xf32>, vector<8x128xf32>, vector<8x8xf32> -> vector<8x8xf32>
    %cst_12 = arith.constant 0.353553385 : f32
    %21 = vector.broadcast %cst_12 : f32 to vector<8x8xf32>
    %22 = arith.mulf %20, %21 : vector<8x8xf32>
    %23 = vector.broadcast %8 : vector<1x8xf32> to vector<8x8xf32>
    %24 = arith.addf %22, %23 : vector<8x8xf32>
    %cst_13 = arith.constant dense<0xFF800000> : vector<8xf32>
    %25 = vector.multi_reduction <maximumf>, %24, %cst_13 [1] : vector<8x8xf32> to vector<8xf32>
    %26 = vector.shape_cast %25 : vector<8xf32> to vector<8x1xf32>
    %27 = vector.broadcast %26 : vector<8x1xf32> to vector<8x8xf32>
    %28 = arith.subf %24, %27 : vector<8x8xf32>
    %29 = math.exp %28 : vector<8x8xf32>
    %cst_14 = arith.constant dense<0.000000e+00> : vector<8xf32>
    %30 = vector.multi_reduction <add>, %29, %cst_14 [1] : vector<8x8xf32> to vector<8xf32>
    %31 = vector.shape_cast %30 : vector<8xf32> to vector<8x1xf32>
    %32 = tpu.reciprocal %31 {approx = true} : vector<8x1xf32> -> vector<8x1xf32>
    %33 = vector.broadcast %32 : vector<8x1xf32> to vector<8x8xf32>
    %34 = arith.mulf %29, %33 : vector<8x8xf32>
    %cst_15 = arith.constant dense<0.000000e+00> : vector<8x128xf32>
    %35 = tpu.matmul %34, %19, %cst_15 {dimension_numbers = #tpu.dot_dimension_numbers<[1], [0], [0], [1], [0, 0, 1, 1], [], []>} : vector<8x8xf32>, vector<8x128xf32>, vector<8x128xf32> -> vector<8x128xf32>
    %36 = vector.extract_strided_slice %16 {offsets = [0, 128], sizes = [8, 128], strides = [1, 1]} : vector<8x1536xf32> to vector<8x128xf32>
    %37 = vector.extract_strided_slice %16 {offsets = [0, 640], sizes = [8, 128], strides = [1, 1]} : vector<8x1536xf32> to vector<8x128xf32>
    %38 = vector.extract_strided_slice %16 {offsets = [0, 1152], sizes = [8, 128], strides = [1, 1]} : vector<8x1536xf32> to vector<8x128xf32>
    %cst_16 = arith.constant dense<0.000000e+00> : vector<8x8xf32>
    %39 = tpu.matmul %36, %37, %cst_16 {dimension_numbers = #tpu.dot_dimension_numbers<[1], [1], [0], [0], [0, 0, 1, 0], [], []>} : vector<8x128xf32>, vector<8x128xf32>, vector<8x8xf32> -> vector<8x8xf32>
    %cst_17 = arith.constant 0.353553385 : f32
    %40 = vector.broadcast %cst_17 : f32 to vector<8x8xf32>
    %41 = arith.mulf %39, %40 : vector<8x8xf32>
    %42 = vector.broadcast %8 : vector<1x8xf32> to vector<8x8xf32>
    %43 = arith.addf %41, %42 : vector<8x8xf32>
    %cst_18 = arith.constant dense<0xFF800000> : vector<8xf32>
    %44 = vector.multi_reduction <maximumf>, %43, %cst_18 [1] : vector<8x8xf32> to vector<8xf32>
    %45 = vector.shape_cast %44 : vector<8xf32> to vector<8x1xf32>
    %46 = vector.broadcast %45 : vector<8x1xf32> to vector<8x8xf32>
    %47 = arith.subf %43, %46 : vector<8x8xf32>
    %48 = math.exp %47 : vector<8x8xf32>
    %cst_19 = arith.constant dense<0.000000e+00> : vector<8xf32>
    %49 = vector.multi_reduction <add>, %48, %cst_19 [1] : vector<8x8xf32> to vector<8xf32>
    %50 = vector.shape_cast %49 : vector<8xf32> to vector<8x1xf32>
    %51 = tpu.reciprocal %50 {approx = true} : vector<8x1xf32> -> vector<8x1xf32>
    %52 = vector.broadcast %51 : vector<8x1xf32> to vector<8x8xf32>
    %53 = arith.mulf %48, %52 : vector<8x8xf32>
    %cst_20 = arith.constant dense<0.000000e+00> : vector<8x128xf32>
    %54 = tpu.matmul %53, %38, %cst_20 {dimension_numbers = #tpu.dot_dimension_numbers<[1], [0], [0], [1], [0, 0, 1, 1], [], []>} : vector<8x8xf32>, vector<8x128xf32>, vector<8x128xf32> -> vector<8x128xf32>
    %55 = vector.extract_strided_slice %16 {offsets = [0, 256], sizes = [8, 128], strides = [1, 1]} : vector<8x1536xf32> to vector<8x128xf32>
    %56 = vector.extract_strided_slice %16 {offsets = [0, 768], sizes = [8, 128], strides = [1, 1]} : vector<8x1536xf32> to vector<8x128xf32>
    %57 = vector.extract_strided_slice %16 {offsets = [0, 1280], sizes = [8, 128], strides = [1, 1]} : vector<8x1536xf32> to vector<8x128xf32>
    %cst_21 = arith.constant dense<0.000000e+00> : vector<8x8xf32>
    %58 = tpu.matmul %55, %56, %cst_21 {dimension_numbers = #tpu.dot_dimension_numbers<[1], [1], [0], [0], [0, 0, 1, 0], [], []>} : vector<8x128xf32>, vector<8x128xf32>, vector<8x8xf32> -> vector<8x8xf32>
    %cst_22 = arith.constant 0.353553385 : f32
    %59 = vector.broadcast %cst_22 : f32 to vector<8x8xf32>
    %60 = arith.mulf %58, %59 : vector<8x8xf32>
    %61 = vector.broadcast %8 : vector<1x8xf32> to vector<8x8xf32>
    %62 = arith.addf %60, %61 : vector<8x8xf32>
    %cst_23 = arith.constant dense<0xFF800000> : vector<8xf32>
    %63 = vector.multi_reduction <maximumf>, %62, %cst_23 [1] : vector<8x8xf32> to vector<8xf32>
    %64 = vector.shape_cast %63 : vector<8xf32> to vector<8x1xf32>
    %65 = vector.broadcast %64 : vector<8x1xf32> to vector<8x8xf32>
    %66 = arith.subf %62, %65 : vector<8x8xf32>
    %67 = math.exp %66 : vector<8x8xf32>
    %cst_24 = arith.constant dense<0.000000e+00> : vector<8xf32>
    %68 = vector.multi_reduction <add>, %67, %cst_24 [1] : vector<8x8xf32> to vector<8xf32>
    %69 = vector.shape_cast %68 : vector<8xf32> to vector<8x1xf32>
    %70 = tpu.reciprocal %69 {approx = true} : vector<8x1xf32> -> vector<8x1xf32>
    %71 = vector.broadcast %70 : vector<8x1xf32> to vector<8x8xf32>
    %72 = arith.mulf %67, %71 : vector<8x8xf32>
    %cst_25 = arith.constant dense<0.000000e+00> : vector<8x128xf32>
    %73 = tpu.matmul %72, %57, %cst_25 {dimension_numbers = #tpu.dot_dimension_numbers<[1], [0], [0], [1], [0, 0, 1, 1], [], []>} : vector<8x8xf32>, vector<8x128xf32>, vector<8x128xf32> -> vector<8x128xf32>
    %74 = vector.extract_strided_slice %16 {offsets = [0, 384], sizes = [8, 128], strides = [1, 1]} : vector<8x1536xf32> to vector<8x128xf32>
    %75 = vector.extract_strided_slice %16 {offsets = [0, 896], sizes = [8, 128], strides = [1, 1]} : vector<8x1536xf32> to vector<8x128xf32>
    %76 = vector.extract_strided_slice %16 {offsets = [0, 1408], sizes = [8, 128], strides = [1, 1]} : vector<8x1536xf32> to vector<8x128xf32>
    %cst_26 = arith.constant dense<0.000000e+00> : vector<8x8xf32>
    %77 = tpu.matmul %74, %75, %cst_26 {dimension_numbers = #tpu.dot_dimension_numbers<[1], [1], [0], [0], [0, 0, 1, 0], [], []>} : vector<8x128xf32>, vector<8x128xf32>, vector<8x8xf32> -> vector<8x8xf32>
    %cst_27 = arith.constant 0.353553385 : f32
    %78 = vector.broadcast %cst_27 : f32 to vector<8x8xf32>
    %79 = arith.mulf %77, %78 : vector<8x8xf32>
    %80 = vector.broadcast %8 : vector<1x8xf32> to vector<8x8xf32>
    %81 = arith.addf %79, %80 : vector<8x8xf32>
    %cst_28 = arith.constant dense<0xFF800000> : vector<8xf32>
    %82 = vector.multi_reduction <maximumf>, %81, %cst_28 [1] : vector<8x8xf32> to vector<8xf32>
    %83 = vector.shape_cast %82 : vector<8xf32> to vector<8x1xf32>
    %84 = vector.broadcast %83 : vector<8x1xf32> to vector<8x8xf32>
    %85 = arith.subf %81, %84 : vector<8x8xf32>
    %86 = math.exp %85 : vector<8x8xf32>
    %cst_29 = arith.constant dense<0.000000e+00> : vector<8xf32>
    %87 = vector.multi_reduction <add>, %86, %cst_29 [1] : vector<8x8xf32> to vector<8xf32>
    %88 = vector.shape_cast %87 : vector<8xf32> to vector<8x1xf32>
    %89 = tpu.reciprocal %88 {approx = true} : vector<8x1xf32> -> vector<8x1xf32>
    %90 = vector.broadcast %89 : vector<8x1xf32> to vector<8x8xf32>
    %91 = arith.mulf %86, %90 : vector<8x8xf32>
    %cst_30 = arith.constant dense<0.000000e+00> : vector<8x128xf32>
    %92 = tpu.matmul %91, %76, %cst_30 {dimension_numbers = #tpu.dot_dimension_numbers<[1], [0], [0], [1], [0, 0, 1, 1], [], []>} : vector<8x8xf32>, vector<8x128xf32>, vector<8x128xf32> -> vector<8x128xf32>
    %93 = tpu.concatenate %35, %54, %73, %92 in 1 : vector<8x128xf32>, vector<8x128xf32>, vector<8x128xf32>, vector<8x128xf32> -> vector<8x512xf32>
    %c0_31 = arith.constant 0 : index
    %c0_32 = arith.constant 0 : index
    %c0_33 = arith.constant 0 : index
    %94 = vector.load %arg6[%c0_31, %c0_32, %c0_33] : memref<1x512x128xf32, #tpu.memory_space<vmem>>, vector<1x512x128xf32>
    %95 = vector.shape_cast %94 : vector<1x512x128xf32> to vector<512x128xf32>
    %cst_34 = arith.constant dense<0.000000e+00> : vector<8x128xf32>
    %96 = tpu.matmul %93, %95, %cst_34 {dimension_numbers = #tpu.dot_dimension_numbers<[1], [0], [0], [1], [0, 0, 1, 1], [], []>} : vector<8x512xf32>, vector<512x128xf32>, vector<8x128xf32> -> vector<8x128xf32>
    %97 = vector.extract_strided_slice %10 {offsets = [1, 0], sizes = [1, 128], strides = [1, 1]} : vector<8x1536xf32> to vector<1x128xf32>
    %98 = vector.broadcast %97 : vector<1x128xf32> to vector<8x128xf32>
    %99 = arith.addf %96, %98 : vector<8x128xf32>
    %100 = arith.addf %99, %6 : vector<8x128xf32>
    %101 = vector.extract_strided_slice %10 {offsets = [2, 0], sizes = [1, 128], strides = [1, 1]} : vector<8x1536xf32> to vector<1x128xf32>
    %102 = vector.extract_strided_slice %10 {offsets = [3, 0], sizes = [1, 128], strides = [1, 1]} : vector<8x1536xf32> to vector<1x128xf32>
    %cst_35 = arith.constant dense<0.000000e+00> : vector<8xf32>
    %103 = vector.multi_reduction <add>, %100, %cst_35 [1] : vector<8x128xf32> to vector<8xf32>
    %104 = vector.shape_cast %103 : vector<8xf32> to vector<8x1xf32>
    %cst_36 = arith.constant 3.125000e-02 : f32
    %105 = vector.broadcast %cst_36 : f32 to vector<8x1xf32>
    %106 = arith.mulf %104, %105 : vector<8x1xf32>
    %107 = vector.broadcast %106 : vector<8x1xf32> to vector<8x128xf32>
    %108 = arith.subf %100, %107 : vector<8x128xf32>
    %cst_37 = arith.constant 0.000000e+00 : f32
    %109 = vector.shape_cast %2 : vector<1x128xi1> to vector<1x128xi1>
    %110 = vector.broadcast %109 : vector<1x128xi1> to vector<8x128xi1>
    %111 = vector.broadcast %cst_37 : f32 to vector<8x128xf32>
    %112 = arith.select %110, %108, %111 : vector<8x128xi1>, vector<8x128xf32>
    %113 = arith.mulf %112, %112 : vector<8x128xf32>
    %cst_38 = arith.constant dense<0.000000e+00> : vector<8xf32>
    %114 = vector.multi_reduction <add>, %113, %cst_38 [1] : vector<8x128xf32> to vector<8xf32>
    %115 = vector.shape_cast %114 : vector<8xf32> to vector<8x1xf32>
    %cst_39 = arith.constant 3.125000e-02 : f32
    %116 = vector.broadcast %cst_39 : f32 to vector<8x1xf32>
    %117 = arith.mulf %115, %116 : vector<8x1xf32>
    %cst_40 = arith.constant 9.99999974E-6 : f32
    %118 = vector.broadcast %cst_40 : f32 to vector<8x1xf32>
    %119 = arith.addf %117, %118 : vector<8x1xf32>
    %120 = math.rsqrt %119 : vector<8x1xf32>
    %121 = vector.broadcast %120 : vector<8x1xf32> to vector<8x128xf32>
    %122 = arith.mulf %108, %121 : vector<8x128xf32>
    %123 = vector.broadcast %101 : vector<1x128xf32> to vector<8x128xf32>
    %124 = arith.mulf %122, %123 : vector<8x128xf32>
    %125 = vector.broadcast %102 : vector<1x128xf32> to vector<8x128xf32>
    %126 = arith.addf %124, %125 : vector<8x128xf32>
    %c0_41 = arith.constant 0 : index
    %c0_42 = arith.constant 0 : index
    %c0_43 = arith.constant 0 : index
    %127 = vector.load %arg7[%c0_41, %c0_42, %c0_43] : memref<1x128x128xf32, #tpu.memory_space<vmem>>, vector<1x128x128xf32>
    %128 = vector.shape_cast %127 : vector<1x128x128xf32> to vector<128x128xf32>
    %cst_44 = arith.constant dense<0.000000e+00> : vector<8x128xf32>
    %129 = tpu.matmul %126, %128, %cst_44 {dimension_numbers = #tpu.dot_dimension_numbers<[1], [0], [0], [1], [0, 0, 1, 1], [], []>} : vector<8x128xf32>, vector<128x128xf32>, vector<8x128xf32> -> vector<8x128xf32>
    %130 = vector.extract_strided_slice %10 {offsets = [4, 0], sizes = [1, 128], strides = [1, 1]} : vector<8x1536xf32> to vector<1x128xf32>
    %131 = vector.broadcast %130 : vector<1x128xf32> to vector<8x128xf32>
    %132 = arith.addf %129, %131 : vector<8x128xf32>
    %cst_45 = arith.constant 5.000000e-01 : f32
    %133 = vector.broadcast %cst_45 : f32 to vector<8x128xf32>
    %134 = arith.mulf %133, %132 : vector<8x128xf32>
    %cst_46 = arith.constant 4.471500e-02 : f32
    %135 = vector.broadcast %cst_46 : f32 to vector<8x128xf32>
    %136 = arith.mulf %135, %132 : vector<8x128xf32>
    %137 = arith.mulf %136, %132 : vector<8x128xf32>
    %138 = arith.mulf %137, %132 : vector<8x128xf32>
    %139 = arith.addf %132, %138 : vector<8x128xf32>
    %cst_47 = arith.constant 0.797884583 : f32
    %140 = vector.broadcast %cst_47 : f32 to vector<8x128xf32>
    %141 = arith.mulf %140, %139 : vector<8x128xf32>
    %142 = math.tanh %141 : vector<8x128xf32>
    %cst_48 = arith.constant 1.000000e+00 : f32
    %143 = vector.broadcast %cst_48 : f32 to vector<8x128xf32>
    %144 = arith.addf %143, %142 : vector<8x128xf32>
    %145 = arith.mulf %134, %144 : vector<8x128xf32>
    %c0_49 = arith.constant 0 : index
    %c0_50 = arith.constant 0 : index
    %c0_51 = arith.constant 0 : index
    %146 = vector.load %arg8[%c0_49, %c0_50, %c0_51] : memref<1x128x128xf32, #tpu.memory_space<vmem>>, vector<1x128x128xf32>
    %147 = vector.shape_cast %146 : vector<1x128x128xf32> to vector<128x128xf32>
    %cst_52 = arith.constant dense<0.000000e+00> : vector<8x128xf32>
    %148 = tpu.matmul %145, %147, %cst_52 {dimension_numbers = #tpu.dot_dimension_numbers<[1], [0], [0], [1], [0, 0, 1, 1], [], []>} : vector<8x128xf32>, vector<128x128xf32>, vector<8x128xf32> -> vector<8x128xf32>
    %149 = vector.extract_strided_slice %10 {offsets = [5, 0], sizes = [1, 128], strides = [1, 1]} : vector<8x1536xf32> to vector<1x128xf32>
    %150 = vector.broadcast %149 : vector<1x128xf32> to vector<8x128xf32>
    %151 = arith.addf %148, %150 : vector<8x128xf32>
    %152 = arith.addf %151, %126 : vector<8x128xf32>
    %153 = vector.extract_strided_slice %10 {offsets = [6, 0], sizes = [1, 128], strides = [1, 1]} : vector<8x1536xf32> to vector<1x128xf32>
    %154 = vector.extract_strided_slice %10 {offsets = [7, 0], sizes = [1, 128], strides = [1, 1]} : vector<8x1536xf32> to vector<1x128xf32>
    %cst_53 = arith.constant dense<0.000000e+00> : vector<8xf32>
    %155 = vector.multi_reduction <add>, %152, %cst_53 [1] : vector<8x128xf32> to vector<8xf32>
    %156 = vector.shape_cast %155 : vector<8xf32> to vector<8x1xf32>
    %cst_54 = arith.constant 3.125000e-02 : f32
    %157 = vector.broadcast %cst_54 : f32 to vector<8x1xf32>
    %158 = arith.mulf %156, %157 : vector<8x1xf32>
    %159 = vector.broadcast %158 : vector<8x1xf32> to vector<8x128xf32>
    %160 = arith.subf %152, %159 : vector<8x128xf32>
    %cst_55 = arith.constant 0.000000e+00 : f32
    %161 = vector.shape_cast %2 : vector<1x128xi1> to vector<1x128xi1>
    %162 = vector.broadcast %161 : vector<1x128xi1> to vector<8x128xi1>
    %163 = vector.broadcast %cst_55 : f32 to vector<8x128xf32>
    %164 = arith.select %162, %160, %163 : vector<8x128xi1>, vector<8x128xf32>
    %165 = arith.mulf %164, %164 : vector<8x128xf32>
    %cst_56 = arith.constant dense<0.000000e+00> : vector<8xf32>
    %166 = vector.multi_reduction <add>, %165, %cst_56 [1] : vector<8x128xf32> to vector<8xf32>
    %167 = vector.shape_cast %166 : vector<8xf32> to vector<8x1xf32>
    %cst_57 = arith.constant 3.125000e-02 : f32
    %168 = vector.broadcast %cst_57 : f32 to vector<8x1xf32>
    %169 = arith.mulf %167, %168 : vector<8x1xf32>
    %cst_58 = arith.constant 9.99999974E-6 : f32
    %170 = vector.broadcast %cst_58 : f32 to vector<8x1xf32>
    %171 = arith.addf %169, %170 : vector<8x1xf32>
    %172 = math.rsqrt %171 : vector<8x1xf32>
    %173 = vector.broadcast %172 : vector<8x1xf32> to vector<8x128xf32>
    %174 = arith.mulf %160, %173 : vector<8x128xf32>
    %175 = vector.broadcast %153 : vector<1x128xf32> to vector<8x128xf32>
    %176 = arith.mulf %174, %175 : vector<8x128xf32>
    %177 = vector.broadcast %154 : vector<1x128xf32> to vector<8x128xf32>
    %178 = arith.addf %176, %177 : vector<8x128xf32>
    %c0_59 = arith.constant 0 : index
    %c0_60 = arith.constant 0 : index
    %179 = vector.load %arg12[%c0_59, %c0_60] : memref<8x128xf32, #tpu.memory_space<vmem>>, vector<8x128xf32>
    tpu.vector_store %arg12[%c0_59, %c0_60], %178 {strides = array<i32>} : memref<8x128xf32, #tpu.memory_space<vmem>>, vector<8x128xf32>,
    %c1_i32 = arith.constant 1 : i32
    %180 = arith.cmpi eq, %arg1, %c1_i32 : i32
    %181 = arith.extui %180 : i1 to i32
    %c0_i32_61 = arith.constant 0 : i32
    %182 = arith.cmpi ne, %181, %c0_i32_61 : i32
    scf.if %182 {
      %c0_62 = arith.constant 0 : index
      %c0_63 = arith.constant 0 : index
      %183 = vector.load %arg10[%c0_62, %c0_63] : memref<128x128xf32, #tpu.memory_space<vmem>>, vector<128x128xf32>
      %cst_64 = arith.constant dense<0.000000e+00> : vector<8x128xf32>
      %184 = tpu.matmul %178, %183, %cst_64 {dimension_numbers = #tpu.dot_dimension_numbers<[1], [0], [0], [1], [0, 0, 1, 1], [], []>} : vector<8x128xf32>, vector<128x128xf32>, vector<8x128xf32> -> vector<8x128xf32>
      %c0_65 = arith.constant 0 : index
      %c0_66 = arith.constant 0 : index
      %185 = vector.load %arg11[%c0_65, %c0_66] : memref<1x128xf32, #tpu.memory_space<vmem>>, vector<1x128xf32>
      %186 = vector.broadcast %185 : vector<1x128xf32> to vector<8x128xf32>
      %187 = arith.addf %184, %186 : vector<8x128xf32>
      %c0_67 = arith.constant 0 : index
      %c0_68 = arith.constant 0 : index
      %188 = vector.load %arg13[%c0_67, %c0_68] : memref<8x128xf32, #tpu.memory_space<vmem>>, vector<8x128xf32>
      tpu.vector_store %arg13[%c0_67, %c0_68], %187 {strides = array<i32>} : memref<8x128xf32, #tpu.memory_space<vmem>>, vector<8x128xf32>,
    } else {
    }
    return
  }
  func.func @transform_0(%arg0: i32, %arg1: i32) -> (i32, i32) {
    %c0_i32 = arith.constant 0 : i32
    %c0_i32_0 = arith.constant 0 : i32
    return %arg0, %c0_i32 : i32, i32
  }
  func.func @transform_1(%arg0: i32, %arg1: i32) -> (i32, i32, i32) {
    %c0_i32 = arith.constant 0 : i32
    %c0_i32_0 = arith.constant 0 : i32
    %c0_i32_1 = arith.constant 0 : i32
    return %arg0, %c0_i32, %c0_i32_0 : i32, i32, i32
  }
  func.func @transform_2(%arg0: i32, %arg1: i32) -> (i32, i32) {
    %c0_i32 = arith.constant 0 : i32
    %c0_i32_0 = arith.constant 0 : i32
    %c0_i32_1 = arith.constant 0 : i32
    return %c0_i32, %c0_i32_0 : i32, i32
  }
  func.func @transform_3(%arg0: i32, %arg1: i32) -> (i32, i32, i32) {
    %c0_i32 = arith.constant 0 : i32
    %c0_i32_0 = arith.constant 0 : i32
    %c0_i32_1 = arith.constant 0 : i32
    return %arg1, %c0_i32, %c0_i32_0 : i32, i32, i32
  }
  func.func @transform_4(%arg0: i32, %arg1: i32) -> (i32, i32, i32) {
    %c0_i32 = arith.constant 0 : i32
    %c0_i32_0 = arith.constant 0 : i32
    %c0_i32_1 = arith.constant 0 : i32
    return %arg1, %c0_i32, %c0_i32_0 : i32, i32, i32
  }
  func.func @transform_5(%arg0: i32, %arg1: i32) -> (i32, i32, i32) {
    %c0_i32 = arith.constant 0 : i32
    %c0_i32_0 = arith.constant 0 : i32
    %c0_i32_1 = arith.constant 0 : i32
    return %arg1, %c0_i32, %c0_i32_0 : i32, i32, i32
  }
  func.func @transform_6(%arg0: i32, %arg1: i32) -> (i32, i32, i32) {
    %c0_i32 = arith.constant 0 : i32
    %c0_i32_0 = arith.constant 0 : i32
    %c0_i32_1 = arith.constant 0 : i32
    return %arg1, %c0_i32, %c0_i32_0 : i32, i32, i32
  }
  func.func @transform_7(%arg0: i32, %arg1: i32) -> (i32, i32, i32) {
    %c0_i32 = arith.constant 0 : i32
    %c0_i32_0 = arith.constant 0 : i32
    %c0_i32_1 = arith.constant 0 : i32
    return %arg1, %c0_i32, %c0_i32_0 : i32, i32, i32
  }
  func.func @transform_8(%arg0: i32, %arg1: i32) -> (i32, i32) {
    %c0_i32 = arith.constant 0 : i32
    %c0_i32_0 = arith.constant 0 : i32
    %c0_i32_1 = arith.constant 0 : i32
    return %c0_i32, %c0_i32_0 : i32, i32
  }
  func.func @transform_9(%arg0: i32, %arg1: i32) -> (i32, i32) {
    %c0_i32 = arith.constant 0 : i32
    %c0_i32_0 = arith.constant 0 : i32
    %c0_i32_1 = arith.constant 0 : i32
    return %c0_i32, %c0_i32_0 : i32, i32
  }
  func.func @transform_10(%arg0: i32, %arg1: i32) -> (i32, i32) {
    %c0_i32 = arith.constant 0 : i32
    %c0_i32_0 = arith.constant 0 : i32
    return %arg0, %c0_i32 : i32, i32
  }
  func.func @transform_11(%arg0: i32, %arg1: i32) -> (i32, i32) {
    %c0_i32 = arith.constant 0 : i32
    %c0_i32_0 = arith.constant 0 : i32
    return %arg0, %c0_i32 : i32, i32
  }
}

</mosaic_0001>

<bundles_post_ra>
// kernel: _lambda_.1
= control target key start
LH: loop header
LB: loop body
LE: loop exit
PB: predicated region body
PF: predicated region fallthrough
CT: control target
= control target key end

     0   :  { %s5068_s0 = inlined_call_operand.vmem [shape: f32[16,128], index: 0, kind: input, shape index: {}]   ;;  %s5069_s1 = inlined_call_operand.vmem [shape: f32[2,1,8], index: 1, kind: input, shape index: {}]   ;;  %s5070_s2 = inlined_call_operand.hbm [shape: f32[2,128], index: 2, kind: input, shape index: {}]   ;;  %s5071_s3 = inlined_call_operand.hbm [shape: f32[2,128,1536], index: 3, kind: input, shape index: {}]   ;;  %s5072_s4 = inlined_call_operand.hbm [shape: f32[2,512,128], index: 4, kind: input, shape index: {}]   ;;  %s5073_s5 = inlined_call_operand.hbm [shape: f32[2,128,128], index: 5, kind: input, shape index: {}]   ;;  %s5074_s6 = inlined_call_operand.hbm [shape: f32[2,128,128], index: 6, kind: input, shape index: {}]   ;;  %s5075_s7 = inlined_call_operand.hbm [shape: f32[2,8,1536], index: 7, kind: input, shape index: {}]   ;;  %s5076_s8 = inlined_call_operand.hbm [shape: f32[128,128], index: 8, kind: input, shape index: {}]   ;;  %s5077_s9 = inlined_call_operand.hbm [shape: f32[1,128], index: 9, kind: input, shape index: {}]   ;;  %s5078_s10 = inlined_call_operand.hbm [shape: f32[16,128], index: 10, kind: output, shape index: {0}]   ;;  %s5079_s11 = inlined_call_operand.vmem [shape: f32[16,128], index: 11, kind: output, shape index: {1}]  }
   0x1   :  { %5116 = sst [smem:[#allocation41_spill]] %s5068_s0 }
   0x2   :  { %5117 = sst [smem:[#allocation42_spill]] %s5069_s1 }
   0x3   :  { %5118 = sst [smem:[#allocation43_spill]] %s5071_s3 }
   0x4   :  { %5119 = sst [smem:[#allocation44_spill]] %s5073_s5 }
   0x5   :  { %5120 = sst [smem:[#allocation45_spill]] %s5076_s8 }
   0x6   :  { %5121 = sst [smem:[#allocation46_spill]] %s5078_s10 }
   0x7   :  { %5122 = sst [smem:[#allocation47_spill]] %s5079_s11 }
   0x8   :  { %17 = vsyncpa [#allocation3], 0 }
   0x9   :  { %18 = vsyncpa [#allocation6], 0 }
   0xa   :  { %20 = vsyncpa [#allocation6 + $0x1], 0 }
   0xb   :  { %21 = vsyncpa [#allocation9], 0 }
   0xc   :  { %23 = vsyncpa [#allocation9 + $0x1], 0 }
   0xd   :  { %24 = vsyncpa [#allocation12], 0 }
   0xe   :  { %26 = vsyncpa [#allocation12 + $0x1], 0 }
   0xf   :  { %27 = vsyncpa [#allocation15], 0 }
  0x10   :  { %28 = vsyncpa [#allocation4], 0 }
  0x11   :  { %30 = vsyncpa [#allocation4 + $0x1], 0  ;;  %s4111_s17 = smov 0   ;;  %s4113_s18 = smov 0  }
  0x12   :  { %s4115_s19 = smov 0   ;;  %s4117_s20 = smov 0  }
  0x13   :  { %s4119_s21 = smov 0   ;;  %s4121_s22 = smov 0  }
  0x14   :  { %s4123_s23 = smov 0   ;;  %s4125_s24 = smov 0  }
  0x15   :  { %s4127_s25 = smov 0   ;;  %s4129_s26 = smov 0  }
  0x16   :  { %s4131_s27 = smov 0  }
  0x17 LB: > { %5123 = sst [smem:[#allocation24_spill]] %s3990_s17  ;;  %s4165_s28 = sadd.s32 4294967295, %s4030_s27   ;;  %s4030_s27 = sphi %s4131_s27, %s36_s27   ;;  %s4026_s26 = sphi %s4129_s26, %s5200_s26   ;;  %s4022_s25 = sphi %s4127_s25, %s5202_s25   ;;  %s4018_s24 = sphi %s4125_s24, %s5198_s24   ;;  %s4014_s23 = sphi %s4123_s23, %s5201_s23   ;;  %s4010_s22 = sphi %s4121_s22, %s5197_s22   ;;  %s4006_s21 = sphi %s4119_s21, %s5196_s21   ;;  %s4002_s20 = sphi %s4117_s20, %s5195_s20   ;;  %s3998_s19 = sphi %s4115_s19, %s5194_s19   ;;  %s3994_s18 = sphi %s4113_s18, %s5193_s18   ;;  %s3990_s17 = sphi %s4111_s17, %s5192_s17  }
  0x18   : > { %5124 = sst [smem:[#allocation25_spill]] %s3994_s18  ;;  %s2806_s29 = sadd.s32 4294967294, %s4030_s27  }
  0x19   : > { %5125 = sst [smem:[#allocation26_spill]] %s3998_s19  ;;  %p135_p0 = scmp.ne.s32.totalorder %s4010_s22, %s4006_s21 }
  0x1a   : > { %5126 = sst [smem:[#allocation27_spill]] %s4006_s21  ;;  %p136_p1 = scmp.eq.s32.totalorder %s4030_s27, 0 }
  0x1b   : > { %5127 = sst [smem:[#allocation28_spill]] %s4010_s22  ;;  %p141_p2 = scmp.ne.s32.totalorder %s4006_s21, %s4002_s20 }
  0x1c   : > { %5128 = sst [smem:[#allocation29_spill]] %s4014_s23  ;;  %p5085_p3 = scmp.eq.s32.totalorder %s4165_s28, 0 }
  0x1d   : > { %5129 = sst [smem:[#allocation30_spill]] %s4018_s24  ;;  %p4175_p4 = por %p136_p1, %p135_p0 }
  0x1e   : > { %5130 = sst [smem:[#allocation31_spill]] %s4026_s26  ;;  %p310_p5 = scmp.ne.s32.totalorder %s3998_s19, %s3994_s18 }
  0x1f   : > { %5131 = sst [smem:[#allocation32_spill]] %s4030_s27  ;;  %p4183_p6 = por %p5085_p3, %p141_p2 }
  0x20   : > { %5132 = sst [smem:[#allocation33_spill]] %s4165_s28  ;;  %p311_p7 = scmp.eq.s32.totalorder %s4165_s28, 3 }
  0x21   : > { %s5133_s13 = scalar_select %p4175_p4, 1, 0 }
  0x22   : > { %s5134_s14 = scalar_select %p4183_p6, 1, 0 }
  0x23   : > { %p316_p8 = scmp.ne.s32.totalorder %s3994_s18, %s3990_s17  ;;  %p317_p9 = scmp.eq.s32.totalorder %s2806_s29, 3 }
  0x24   : > { %5135 = sst [smem:[#allocation34_spill]] %s5134_s14  ;;  %p4190_p10 = por %p311_p7, %p310_p5 }
  0x25   : > { %p2807_p11 = scmp.ge.s32.totalorder %s4030_s27, 1  ;;  %p4195_p12 = por %p317_p9, %p316_p8 }
  0x26   : > { %s5136_s15 = scalar_select %p4190_p10, 1, 0 }
  0x27   : > { %s5138_s16 = scalar_select %p4195_p12, 1, 0 }
  0x28   : > { %5137 = sst [smem:[#allocation35_spill]] %s5136_s15  ;;  %p350_p13 = scmp.lt.s32.totalorder %s4030_s27, 5 }
  0x29   : > { %5139 = sst [smem:[#allocation36_spill]] %s5138_s16  ;;  %s4032_s12 = smov [#allocation13]  }
  0x2a   : > { %p4200_p0 = pnand %p2807_p11, %p350_p13  ;;  %s373_s30 = sshll.u32 %s4032_s12, 4  ;;  %s374_s30 = int_to_ptr.vmem [resolvable:$true] %s373_s30 }
  0x2b   : > { %s45_s17 = sadd.s32 1, %s4022_s25  ;;  %s5142_s8 = sld [smem:[#allocation45_spill]] }
  0x2c   : > { %s5140_s20 = scalar_select %p4200_p0, 1, 0 }
  0x2d   : > { %p3490_p1 = pneg %p4200_p0 }
  0x2f   : > { %p4208_p2 = pnand %p3490_p1, %p5085_p3 }
  0x31   : > { %s5141_s29 = scalar_select %p4208_p2, 1, 0 }
  0x32   : > { %s3654_s15 = scalar_lea.hbm %s5142_s8, 2048  ;;  %p4221_p7 = pneg %p4208_p2 }
  0x33   : > { %p3655_p5 = scmp.ne.s32.totalorder %s5142_s8, %s3654_s15  ;;  %p3661_p11 = scmp.lt.u32.totalorder %s3654_s15, %s5142_s8 }
  0x34   : > { %s5143_s12 = scalar_select %p4221_p7, 1, 0 }
  0x35   : > { %p3657_p8 = pnand %p4221_p7, %p3655_p5 }
  0x37   : > { %p3658_p9 = pneg %p3657_p8 }
  0x39   : > { %p3663_p13 = pnand %p3661_p11, %p3658_p9 }
  0x3b   : > { %3666 = shalt.err (!%p3663_p13)
}
  0x3c   : > { %s3667_s10 = scalar_lea.vmem %s374_s30, 2048  ;;  %p3675_p10 = scmp.lt.s32.totalorder %s374_s30, %s374_s30 }
  0x3d   : > { %p3668_p1 = scmp.ne.s32.totalorder %s374_s30, %s3667_s10  ;;  %p3676_p6 = scmp.lt.s32.totalorder %s3667_s10, %s3667_s10 }
  0x3f   : > { %p3670_p3 = pnand %p3668_p1, %p4221_p7  ;;  %p3677_p0 = por %p3676_p6, %p3675_p10 }
  0x41   : > { %p3671_p12 = pneg %p3670_p3 }
  0x43   : > { %p3678_p4 = pnand %p3677_p0, %p3671_p12 }
  0x45   : > { %3681 = shalt.err (!%p3678_p4)
}
  0x46   : > { %s5090_s11 = smov 128   ;;  %s5092_s0 = smov 8  }
  0x47   : > { %3496 = dma.hbm_to_vmem [thread:$0]  (!%p4208_p2), %s5142_s8, 2048, %s374_s30, [#allocation12], %s5090_s11, %s5090_s11, %s5092_s0  }
  0x48   : > { %p46_p3 = scmp.ge.s32.totalorder %s45_s17, 2  ;;  %s48_s15 = sadd.s32 1, %s4026_s26 }
  0x49   : > { %p3523_p4 = scmp.lt.s32.totalorder %s4030_s27, 4  ;;  %s4243_s16 = sand.u32 1, %s4030_s27  }
  0x4a   : > { %s5204_s17 = smov (%p46_p3, %s45_s17), 0  ;;  %s5206_s15 = smov (!%p46_p3, %s48_s15), %s4026_s26 }
  0x4b   : > { %5144 = sst [smem:[#allocation37_spill]] %s5204_s17  ;;  %s125_s10 = ssub.s32 %s4022_s25, %s5204_s17 }
  0x4c   : > { %p50_p6 = scmp.ge.s32.totalorder %s5206_s15, 2  ;;  %p126_p10 = scmp.eq.s32.totalorder %s125_s10, 0 }
  0x4d   : > { %s4251_s24 = sand.u32 1, %s4010_s22   ;;  %s3461_s30 = smul.u32 24576, %s4022_s25 }
  0x4e   : > { %s5208_s15 = smov (%p50_p6, %s5206_s15), 0  ;;  %s5146_s1 = sadd.s32 1, %s4010_s22 }
  0x4f   : > { %5145 = sst [smem:[#allocation38_spill]] %s5208_s15  ;;  %s297_s11 = ssub.s32 %s4026_s26, %s5208_s15 }
  0x50   : > { %s4259_s23 = scalar_select %p126_p10, %s4010_s22, %s5146_s1  }
  0x51   : > { %s3460_s0 = smul.u32 1536, %s4251_s24  ;;  %p298_p12 = scmp.eq.s32.totalorder %s297_s11, 0 }
  0x52   : > { %5147 = sst [smem:[#allocation39_spill]] %s4259_s23  ;;  %s5148_s3 = sld [smem:[#allocation43_spill]] }
  0x53   : > { %p5149_p0 = scmp.ne.s32.totalorder %s5133_s13, 0  ;;  %s5151_s1 = sadd.s32 1, %s3998_s19 }
  0x54   : > { %s4280_s15 = scalar_select %p298_p12, %s3998_s19, %s5151_s1  }
  0x55   : > { %p4273_p5 = pnand %p3523_p4, %p5149_p0  ;;  %s415_s11 = scalar_lea.vmem [#allocation5], %s3460_s0 }
  0x56   : > { %5152 = sst [smem:[#allocation40_spill]] %s4280_s15  ;;  %s422_s26 = sshll.u32 %s415_s11, 4  ;;  %s4282_s26 = int_to_ptr.vmem [resolvable:$true] %s422_s26 }
  0x57   : > { %s5150_s10 = scalar_select %p4273_p5, 1, 0 }
  0x58   : > { %s4267_s17 = scalar_lea.hbm %s5148_s3, %s3461_s30  ;;  %p4289_p9 = pneg %p4273_p5 }
  0x59   : > { %s3682_s18 = scalar_lea.hbm %s4267_s17, 24576  ;;  %s3687_s1 = scalar_lea.hbm %s5148_s3, 49152 }
  0x5a   : > { %p3683_p8 = scmp.ne.s32.totalorder %s4267_s17, %s3682_s18  ;;  %p3688_p1 = scmp.lt.u32.totalorder %s4267_s17, %s5148_s3 }
  0x5b   : > { %p3689_p3 = scmp.lt.u32.totalorder %s3687_s1, %s3682_s18  ;;  %p3691_p6 = scmp.lt.u32.totalorder %s3682_s18, %s4267_s17 }
  0x5c   : > { %p3685_p11 = pnand %p4289_p9, %p3683_p8 }
  0x5d   : > { %p3690_p4 = por %p3689_p3, %p3688_p1 }
  0x5e   : > { %p3686_p13 = pneg %p3685_p11 }
  0x5f   : > { %p3692_p10 = por %p3691_p6, %p3690_p4 }
  0x61   : > { %p3693_p12 = pnand %p3692_p10, %p3686_p13 }
  0x63   : > { %3696 = shalt.err (!%p3693_p12)
}
  0x64   : > { %s3697_s8 = scalar_lea.vmem %s4282_s26, 24576  ;;  %s4035_s23 = smov [#allocation5]  }
  0x65   : > { %p3698_p0 = scmp.ne.s32.totalorder %s4282_s26, %s3697_s8  ;;  %s3702_s30 = sshll.u32 %s4035_s23, 4  ;;  %s3703_s30 = int_to_ptr.vmem [resolvable:$false] %s3702_s30 }
  0x66   : > { %s3704_s0 = scalar_lea.vmem %s3703_s30, 49152  ;;  %p3705_p2 = scmp.lt.s32.totalorder %s4282_s26, %s3703_s30 }
  0x67   : > { %p3700_p8 = pnand %p3698_p0, %p4289_p9  ;;  %p3706_p7 = scmp.lt.s32.totalorder %s3704_s0, %s3697_s8 }
  0x69   : > { %p3701_p11 = pneg %p3700_p8  ;;  %p3707_p1 = por %p3706_p7, %p3705_p2 }
  0x6b   : > { %p3708_p3 = pnand %p3707_p1, %p3701_p11 }
  0x6d   : > { %3711 = shalt.err (!%p3708_p3)
}
  0x6e   : > { %s4036_s18 = smov 1536   ;;  %s4037_s1 = smov 96  }
  0x6f   : > { %s5154_s11 = scalar_lea.sflag [#allocation6], %s4243_s16  ;;  %s5107_s23 = sshll.u32 %s4251_s24, 7 }
  0x70   : > { %3503 = dma.hbm_to_vmem [thread:$0]  (!%p4273_p5), %s4267_s17, 24576, %s4282_s26, %s5154_s11, %s4036_s18, %s4036_s18, %s4037_s1  }
  0x71   : > { %s2848_s30 = sshll.u32 %s4022_s25, 11  ;;  %s5155_s5 = sld [smem:[#allocation44_spill]] }
  0x72   : > { %s457_s22 = scalar_lea.vmem [#allocation8], %s5107_s23  ;;  %s4328_s17 = scalar_lea.hbm %s5074_s6, %s2848_s30 }
  0x73   : > { %s464_s15 = sshll.u32 %s457_s22, 4  ;;  %s454_s26 = scalar_lea.sflag [#allocation9], %s4243_s16  ;;  %s4323_s15 = int_to_ptr.vmem [resolvable:$true] %s464_s15 }
  0x77   : > { %s4319_s3 = scalar_lea.hbm %s5155_s5, %s2848_s30  ;;  %s3717_s8 = scalar_lea.hbm %s5155_s5, 4096 }
  0x78   : > { %s3712_s18 = scalar_lea.hbm %s4319_s3, 2048  ;;  %p3718_p4 = scmp.lt.u32.totalorder %s4319_s3, %s5155_s5 }
  0x79   : > { %p3713_p2 = scmp.ne.s32.totalorder %s4319_s3, %s3712_s18  ;;  %p3719_p6 = scmp.lt.u32.totalorder %s3717_s8, %s3712_s18 }
  0x7a   : > { %p3721_p12 = scmp.lt.u32.totalorder %s3712_s18, %s4319_s3 }
  0x7b   : > { %p3715_p7 = pnand %p3713_p2, %p4289_p9  ;;  %p3720_p10 = por %p3719_p6, %p3718_p4 }
  0x7d   : > { %p3716_p13 = pneg %p3715_p7  ;;  %p3722_p0 = por %p3721_p12, %p3720_p10 }
  0x7f   : > { %p3723_p8 = pnand %p3722_p0, %p3716_p13 }
  0x81   : > { %3726 = shalt.err (!%p3723_p8)
}
  0x82   : > { %s3727_s19 = scalar_lea.vmem %s4323_s15, 2048  ;;  %s4038_s22 = smov [#allocation8]  }
  0x83   : > { %p3728_p11 = scmp.ne.s32.totalorder %s4323_s15, %s3727_s19  ;;  %s3732_s27 = sshll.u32 %s4038_s22, 4  ;;  %s3733_s27 = int_to_ptr.vmem [resolvable:$false] %s3732_s27 }
  0x84   : > { %s3734_s23 = scalar_lea.vmem %s3733_s27, 4096  ;;  %p3735_p2 = scmp.lt.s32.totalorder %s4323_s15, %s3733_s27 }
  0x85   : > { %p3730_p1 = pnand %p3728_p11, %p4289_p9  ;;  %p3736_p7 = scmp.lt.s32.totalorder %s3734_s23, %s3727_s19 }
  0x87   : > { %p3731_p3 = pneg %p3730_p1  ;;  %p3737_p4 = por %p3736_p7, %p3735_p2 }
  0x89   : > { %p3738_p6 = pnand %p3737_p4, %p3731_p3 }
  0x8b   : > { %3741 = shalt.err (!%p3738_p6)
}
  0x8c   : > { %s5156_s30 = smov 8   ;;  %s5157_s18 = smov 128  }
  0x8d   : > { %3509 = dma.hbm_to_vmem [thread:$0]  (!%p4273_p5), %s4319_s3, 2048, %s4323_s15, %s454_s26, %s5157_s18, %s5157_s18, %s5156_s30  }
  0x8e   : > { %s5158_s1 = sshll.u32 %s4251_s24, 7  ;;  %s4039_s0 = smov [#allocation2]  }
  0x8f   : > { %s478_s11 = scalar_lea.vmem [#allocation10], %s5158_s1  ;;  %s363_s19 = sshll.u32 %s4039_s0, 4  ;;  %s364_s19 = int_to_ptr.vmem [resolvable:$true] %s363_s19 }
  0x90   : > { %s485_s8 = sshll.u32 %s478_s11, 4  ;;  %s4040_s22 = smov [#allocation14]   ;;  %s4359_s8 = int_to_ptr.vmem [resolvable:$true] %s485_s8 }
  0x91   : > { %s387_s27 = sshll.u32 %s4040_s22, 4  ;;  %s3742_s14 = scalar_lea.hbm %s5070_s2, 32  ;;  %s4361_s27 = int_to_ptr.vmem [resolvable:$true] %s387_s27 }
  0x92   : > { %p3743_p13 = scmp.ne.s32.totalorder %s5070_s2, %s3742_s14  ;;  %p5159_p10 = scmp.ne.s32.totalorder %s5143_s12, 0 }
  0x93   : > { %p3749_p8 = scmp.lt.u32.totalorder %s3742_s14, %s5070_s2 }
  0x94   : > { %p3745_p12 = pnand %p3743_p13, %p5159_p10 }
  0x96   : > { %p3746_p0 = pneg %p3745_p12 }
  0x98   : > { %p3751_p11 = pnand %p3749_p8, %p3746_p0 }
  0x9a   : > { %3754 = shalt.err (!%p3751_p11)
}
  0x9b   : > { %s3755_s1 = scalar_lea.vmem %s364_s19, 32  ;;  %p3763_p7 = scmp.lt.s32.totalorder %s364_s19, %s364_s19 }
  0x9c   : > { %p3756_p1 = scmp.ne.s32.totalorder %s364_s19, %s3755_s1  ;;  %p3764_p4 = scmp.lt.s32.totalorder %s3755_s1, %s3755_s1 }
  0x9e   : > { %p3758_p3 = pnand %p3756_p1, %p5159_p10  ;;  %p3765_p6 = por %p3764_p4, %p3763_p7 }
  0xa0   : > { %p3759_p2 = pneg %p3758_p3 }
  0xa2   : > { %p3766_p5 = pnand %p3765_p6, %p3759_p2 }
  0xa4   : > { %3769 = shalt.err (!%p3766_p5)
}
  0xa5   : > { %p5160_p13 = scmp.ne.s32.totalorder %s5141_s29, 0  ;;  %s3770_s11 = scalar_lea.hbm %s5077_s9, 16 }
  0xa6   : > { %p3771_p12 = scmp.ne.s32.totalorder %s5077_s9, %s3770_s11  ;;  %p3777_p5 = scmp.lt.u32.totalorder %s3770_s11, %s5077_s9 }
  0xa7   : > { %3493 = dma.hbm_to_vmem [thread:$0]  (!%p5160_p13), %s5070_s2, 32, %s364_s19, [#allocation3]  }
  0xa8   : > { %p3773_p0 = pnand %p3771_p12, %p5159_p10 }
  0xaa   : > { %p3774_p8 = pneg %p3773_p0 }
  0xac   : > { %p3779_p11 = pnand %p3777_p5, %p3774_p8 }
  0xae   : > { %3782 = shalt.err (!%p3779_p11)
}
  0xaf   : > { %s3783_s19 = scalar_lea.vmem %s4361_s27, 16  ;;  %s3790_s15 = scalar_lea.vmem %s4361_s27, 32 }
  0xb0   : > { %p3784_p1 = scmp.ne.s32.totalorder %s4361_s27, %s3783_s19  ;;  %p3791_p7 = scmp.lt.s32.totalorder %s4361_s27, %s4361_s27 }
  0xb1   : > { %p3792_p4 = scmp.lt.s32.totalorder %s3790_s15, %s3783_s19 }
  0xb2   : > { %p3786_p3 = pnand %p3784_p1, %p5159_p10 }
  0xb3   : > { %p3793_p6 = por %p3792_p4, %p3791_p7 }
  0xb4   : > { %p3787_p2 = pneg %p3786_p3 }
  0xb6   : > { %p3794_p12 = pnand %p3793_p6, %p3787_p2 }
  0xb8   : > { %3797 = shalt.err (!%p3794_p12)
}
  0xb9   : > { %3499 = dma.hbm_to_vmem [thread:$0]  (!%p5160_p13), %s5077_s9, 16, %s4361_s27, [#allocation15]  }
  0xba   : > { %s2813_s12 = sshll.u32 %s4251_s24, 9  ;;  %s2847_s21 = sshll.u32 %s4022_s25, 13 }
  0xbb   : > { %s4410_s11 = scalar_lea.hbm %s5072_s4, %s2847_s21  ;;  %s436_s29 = scalar_lea.vmem [#allocation7], %s2813_s12 }
  0xbc   : > { %s443_s0 = sshll.u32 %s436_s29, 4  ;;  %s3462_s22 = smul.u32 96, %s4251_s24  ;;  %s4412_s0 = int_to_ptr.vmem [resolvable:$true] %s443_s0 }
  0xbd   : > { %s3798_s23 = scalar_lea.hbm %s4410_s11, 8192  ;;  %s3803_s19 = scalar_lea.hbm %s5072_s4, 16384 }
  0xbe   : > { %p3799_p10 = scmp.ne.s32.totalorder %s4410_s11, %s3798_s23  ;;  %p3804_p8 = scmp.lt.u32.totalorder %s4410_s11, %s5072_s4 }
  0xbf   : > { %p3805_p5 = scmp.lt.u32.totalorder %s3803_s19, %s3798_s23  ;;  %p3807_p1 = scmp.lt.u32.totalorder %s3798_s23, %s4410_s11 }
  0xc0   : > { %p3801_p13 = pnand %p3799_p10, %p4289_p9 }
  0xc1   : > { %p3806_p11 = por %p3805_p5, %p3804_p8 }
  0xc2   : > { %p3802_p0 = pneg %p3801_p13 }
  0xc3   : > { %p3808_p3 = por %p3807_p1, %p3806_p11 }
  0xc5   : > { %p3809_p2 = pnand %p3808_p3, %p3802_p0 }
  0xc7   : > { %3812 = shalt.err (!%p3809_p2)
}
  0xc8   : > { %s3813_s5 = scalar_lea.vmem %s4412_s0, 8192  ;;  %s4041_s12 = smov [#allocation7]  }
  0xc9   : > { %p3814_p7 = scmp.ne.s32.totalorder %s4412_s0, %s3813_s5  ;;  %s3818_s21 = sshll.u32 %s4041_s12, 4  ;;  %s3819_s21 = int_to_ptr.vmem [resolvable:$false] %s3818_s21 }
  0xca   : > { %s3820_s28 = scalar_lea.vmem %s3819_s21, 16384  ;;  %p3821_p12 = scmp.lt.s32.totalorder %s4412_s0, %s3819_s21 }
  0xcb   : > { %p3816_p4 = pnand %p3814_p7, %p4289_p9  ;;  %p3822_p10 = scmp.lt.s32.totalorder %s3820_s28, %s3813_s5 }
  0xcd   : > { %p3817_p6 = pneg %p3816_p4  ;;  %p3823_p13 = por %p3822_p10, %p3821_p12 }
  0xcf   : > { %p3824_p8 = pnand %p3823_p13, %p3817_p6 }
  0xd1   : > { %3827 = shalt.err (!%p3824_p8)
}
  0xd2   : > { %p5161_p0 = scmp.ne.s32.totalorder %s5150_s10, 0  ;;  %s5162_s14 = scalar_lea.sflag [#allocation6], %s4243_s16 }
  0xd3   : > { %s3828_s29 = scalar_lea.hbm %s4328_s17, 2048  ;;  %s3833_s3 = scalar_lea.hbm %s5074_s6, 4096 }
  0xd4   : > { %3506 = dma.hbm_to_vmem [thread:$0]  (!%p5161_p0), %s4410_s11, 8192, %s4412_s0, %s5162_s14, %s5157_s18, %s5157_s18, %s5156_s30  }
  0xd5   : > { %p3829_p5 = scmp.ne.s32.totalorder %s4328_s17, %s3828_s29  ;;  %p3834_p3 = scmp.lt.u32.totalorder %s4328_s17, %s5074_s6 }
  0xd6   : > { %p3835_p2 = scmp.lt.u32.totalorder %s3833_s3, %s3828_s29  ;;  %p3837_p4 = scmp.lt.u32.totalorder %s3828_s29, %s4328_s17 }
  0xd7   : > { %p3831_p11 = pnand %p3829_p5, %p4289_p9 }
  0xd8   : > { %p3836_p7 = por %p3835_p2, %p3834_p3 }
  0xd9   : > { %p3832_p1 = pneg %p3831_p11 }
  0xda   : > { %p3838_p6 = por %p3837_p4, %p3836_p7 }
  0xdc   : > { %p3839_p12 = pnand %p3838_p6, %p3832_p1 }
  0xde   : > { %3842 = shalt.err (!%p3839_p12)
}
  0xdf   : > { %s3843_s11 = scalar_lea.vmem %s4359_s8, 2048  ;;  %s4042_s0 = smov [#allocation10]  }
  0xe0   : > { %p3844_p10 = scmp.ne.s32.totalorder %s4359_s8, %s3843_s11  ;;  %s3848_s1 = sshll.u32 %s4042_s0, 4  ;;  %s3849_s1 = int_to_ptr.vmem [resolvable:$false] %s3848_s1 }
  0xe1   : > { %s3850_s5 = scalar_lea.vmem %s3849_s1, 4096  ;;  %p3851_p5 = scmp.lt.s32.totalorder %s4359_s8, %s3849_s1 }
  0xe2   : > { %p3846_p13 = pnand %p3844_p10, %p4289_p9  ;;  %p3852_p11 = scmp.lt.s32.totalorder %s3850_s5, %s3843_s11 }
  0xe4   : > { %p3847_p8 = pneg %p3846_p13  ;;  %p3853_p3 = por %p3852_p11, %p3851_p5 }
  0xe6   : > { %p3854_p2 = pnand %p3853_p3, %p3847_p8 }
  0xe8   : > { %3857 = shalt.err (!%p3854_p2)
}
  0xe9   : > { %3512 = dma.hbm_to_vmem [thread:$0]  (!%p5161_p0), %s4328_s17, 2048, %s4359_s8, %s454_s26, %s5157_s18, %s5157_s18, %s5156_s30  }
  0xea   : > { %s3463_s12 = smul.u32 1536, %s4022_s25  ;;  %s499_s21 = scalar_lea.vmem [#allocation11], %s3462_s22 }
  0xeb   : > { %s507_s28 = sshll.u32 %s499_s21, 4  ;;  %s496_s27 = scalar_lea.sflag [#allocation12], %s4243_s16  ;;  %s508_s28 = int_to_ptr.vmem [resolvable:$true] %s507_s28 }
  0xec   : > { %s4473_s23 = scalar_lea.hbm %s5075_s7, %s3463_s12  ;;  %s3863_s26 = scalar_lea.hbm %s5075_s7, 3072 }
  0xed   : > { %s3858_s3 = scalar_lea.hbm %s4473_s23, 1536  ;;  %p3864_p6 = scmp.lt.u32.totalorder %s4473_s23, %s5075_s7 }
  0xee   : > { %p3859_p1 = scmp.ne.s32.totalorder %s4473_s23, %s3858_s3  ;;  %p3865_p12 = scmp.lt.u32.totalorder %s3863_s26, %s3858_s3 }
  0xef   : > { %p3867_p13 = scmp.lt.u32.totalorder %s3858_s3, %s4473_s23 }
  0xf0   : > { %p3861_p7 = pnand %p3859_p1, %p4289_p9  ;;  %p3866_p10 = por %p3865_p12, %p3864_p6 }
  0xf2   : > { %p3862_p4 = pneg %p3861_p7  ;;  %p3868_p8 = por %p3867_p13, %p3866_p10 }
  0xf4   : > { %p3869_p5 = pnand %p3868_p8, %p3862_p4 }
  0xf6   : > { %3872 = shalt.err (!%p3869_p5)
}
  0xf7   : > { %s3873_s16 = scalar_lea.vmem %s508_s28, 1536  ;;  %s4043_s8 = smov [#allocation11]  }
  0xf8   : > { %p3874_p11 = scmp.ne.s32.totalorder %s508_s28, %s3873_s16  ;;  %s3878_s22 = sshll.u32 %s4043_s8, 4  ;;  %s3879_s22 = int_to_ptr.vmem [resolvable:$false] %s3878_s22 }
  0xf9   : > { %s3880_s19 = scalar_lea.vmem %s3879_s22, 3072  ;;  %p3881_p1 = scmp.lt.s32.totalorder %s508_s28, %s3879_s22 }
  0xfa   : > { %p3876_p3 = pnand %p3874_p11, %p4289_p9  ;;  %p3882_p7 = scmp.lt.s32.totalorder %s3880_s19, %s3873_s16 }
  0xfc   : > { %p3877_p2 = pneg %p3876_p3  ;;  %p3883_p0 = por %p3882_p7, %p3881_p1 }
  0xfe   : > { %p3884_p6 = pnand %p3883_p0, %p3877_p2 }
 0x100   : > { %3887 = shalt.err (!%p3884_p6)
}
 0x101   : > { %p5163_p12 = scmp.ne.s32.totalorder %s5150_s10, 0  ;;  %p5164_p4 = scmp.ne.s32.totalorder %s5140_s20, 0 }
 0x102   : > { %s5165_s15 = sld [smem:[#allocation33_spill]] (!%p5164_p4) }
 0x103   : > { %3515 = dma.hbm_to_vmem [thread:$0]  (!%p5163_p12), %s4473_s23, 1536, %s508_s28, %s496_s27  }
 0x104   : > { %516 = sbr.rel (%p5164_p4) target bundleno = 3199 (0xc7f), region = 60 }
 0x108   : > { %p5166_p10 = scmp.eq.s32.totalorder (!%p5164_p4), %s5165_s15, 0 }
 0x10b   : > { %3961 = dma.done.wait (%p5166_p10), [#allocation3], 32   ;;  %p5167_p9 = pmov %p5166_p10 }
 0x10c   : > { %s5168_s13 = sld [smem:[#allocation27_spill]]  ;;  %s5169_s11 = sld [smem:[#allocation34_spill]] }
 0x10d   : > { %3963 = vsyncadd (%p5167_p9), [#allocation3], 4294967264  ;;  %s522_s0 = sand.u32 1, %s5165_s15  }
 0x10e   : > { %s523_s12 = scalar_lea.sflag [#allocation6], %s522_s0 }
 0x112   : > { %s524_s1 = sand.u32 1, %s5168_s13   ;;  %p5170_p0 = scmp.ne.s32.totalorder %s5169_s11, 0 }
 0x113   : > { %s3464_s5 = smul.u32 1536, %s524_s1 }
 0x115   : > { %s4501_s21 = scalar_lea.vmem [#allocation5], %s3464_s5 }
 0x116   : > { %3965 = dma.done.wait (%p5170_p0), %s523_s12, 32768  }
 0x117   : > { %3967 = vsyncadd (%p5170_p0), %s523_s12, 4294934528  ;;  %s2825_s20 = sshll.u32 %s524_s1, 9  ;;  %s2826_s10 = sshll.u32 %s524_s1, 7 }
 0x118   : > { %s4507_s28 = scalar_lea.vmem [#allocation7], %s2825_s20  ;;  %s541_s14 = scalar_lea.sflag [#allocation9], %s522_s0 }
 0x119   : > { %s4509_s29 = scalar_lea.vmem [#allocation8], %s2826_s10 }
 0x11a   : > { %3969 = dma.done.wait (%p5170_p0), %s541_s14, 4096  }
 0x11b   : > { %3971 = vsyncadd (%p5170_p0), %s541_s14, 4294963200  ;;  %s3465_s23 = smul.u32 96, %s524_s1  ;;  %s4515_s27 = scalar_lea.vmem [#allocation10], %s2826_s10 }
 0x11c   : > { %s559_s3 = scalar_lea.sflag [#allocation12], %s522_s0 }
 0x11d   : > { %s4517_s17 = scalar_lea.vmem [#allocation11], %s3465_s23 }
 0x11e   : > { %3973 = dma.done.wait (%p5170_p0), %s559_s3, 1536  }
 0x11f   : > { %3975 = vsyncadd (%p5170_p0), %s559_s3, 4294965760  ;;  %p5171_p13 = pmov %p5167_p9 }
 0x120   : > { %p5172_p8 = pmov %p5167_p9 }
 0x121   : > { %3977 = dma.done.wait (%p5171_p13), [#allocation12], 2048  }
 0x122   : > { %3979 = vsyncadd (%p5172_p8), [#allocation12], 4294965248  ;;  %p5173_p5 = pmov %p5172_p8 }
 0x124   : > { %3981 = dma.done.wait (%p5173_p5), [#allocation15], 16   ;;  %p5174_p11 = pmov %p5173_p5 }
 0x125   : > { %s5175_s24 = sld [smem:[#allocation25_spill]]  ;;  %s5176_s26 = sld [smem:[#allocation30_spill]]  ;;  %v651_v0 = vlaneseq }
 0x126   : > { %3983 = vsyncadd (%p5174_p11), [#allocation15], 4294967280  ;;  %s5177_s19 = sld [smem:[#allocation42_spill]]  ;;  %s5178_s0 = sld [smem:[#allocation41_spill]] }
 0x127   : > { %v4536_v1 = vand.u32 127, %v651_v0  ;;  %s5179_s20 = sld [smem:[#allocation47_spill]]  ;;  %s5180_s23 = sld [smem:[#allocation29_spill]] }
 0x129   : > { %vm653_vm0 = vcmp.lt.s32.totalorder %v4536_v1, 32 }
 0x12b   : > { %s631_s30 = sand.u32 1, %s5175_s24   ;;  %p640_p3 = scmp.lt.s32.totalorder %s5176_s26, 1 }
 0x12c   : > { %s2830_s18 = sshll.u32 %s631_s30, 3 }
 0x12d   : > { %s5210_s26 = smov (!%p640_p3, %s5176_s26), 1  ;;  %s4555_s14 = scalar_lea.vmem [#allocation16], %s2830_s18 }
 0x12e   : > { %s2831_s16 = sshll.u32 %s5210_s26, 3  ;;  %s646_s15 = scalar_lea.vmem %s5177_s19, %s5210_s26 }
 0x12f   : > { %s643_s1 = scalar_lea.vmem %s5178_s0, %s2831_s16  ;;  %s4553_s10 = scalar_lea.vmem %s5179_s20, %s2831_s16 }
 0x130   : > { %p2833_p2 = scmp.ne.s32.totalorder %s5180_s23, 0 }
 0x131   : > { %v658_v2 = vld [vmem:[%s643_s1] sm:$0xff] (!%p2833_p2) }
 0x132   : > { %657 = sbr.rel (%p2833_p2) target bundleno = 619 (0x26b), region = 96  ;;  %661 = vadd.xlane.f32.xlu0 (!%p2833_p2), %v658_v2  ;;  %v2834_v12 = vld [vmem:[#allocation2] ss:$0 sm:$0xff] (!%p2833_p2)  ;;  %v2835_v14 = vld [vmem:[#allocation2 + $0x1] ss:$0 sm:$0xff] (!%p2833_p2) }
 0x1bf   : > { %v662_v3 = vpop.xlane.xlu0 %661 }
 0x1c0   : > { %v663_v4 = vmul.f32 0.03125, %v662_v3 }
 0x1c2   : > { %v664_v5 = vsub.f32 %v658_v2, %v663_v4 }
 0x1c4   : > { %v667_v6 = vsel %vm653_vm0, %v664_v5, 0.0 }
 0x1c5   : > { %v668_v7 = vmul.f32 %v667_v6, %v667_v6 }
 0x1c7   : > { %669 = vadd.xlane.f32.xlu0 %v668_v7 }
 0x254   : > { %v670_v8 = vpop.xlane.xlu0 %669 }
 0x255   : > { %v671_v9 = vmul.f32 0.03125, %v670_v8 }
 0x257   : > { %v672_v10 = vadd.f32 1e-05, %v671_v9 }
 0x259   : > { %3629 = vrsqrt.f32 %v672_v10 }
 0x263   : > { %v3630_v11 = vpop.eup %3629 }
 0x264   : > { %v674_v13 = vmul.f32 %v3630_v11, %v664_v5 }
 0x266   : > { %v679_v15 = vmul.f32 %v2834_v12, %v674_v13 }
 0x268   : > { %v684_v16 = vadd.f32 %v2835_v14, %v679_v15 }
 0x26a   : > { %685 = vst [vmem:[%s4555_s14] sm:$0xff] %v684_v16 }
 0x26b PF: > { %v701_v17 = vld [vmem:[%s4501_s21 + $0x8] sm:$0xff]  ;;  %v700_v19 = vld [vmem:[%s4501_s21] sm:$0xff]  ;;  %v4044_v24 = vmov 0.0   ;;  %v703_v29 = vld [vmem:[%s4501_s21 + $0x18] sm:$0xff]  ;;  %vm4045_vm1 = vmmov 0   ;;  %vm1444_vm2 = vcmask 64512  }
 0x26c   : > { %v713_v18 = vld [vmem:[%s4501_s21 + $0x68] sm:$0xff]  ;;  %v712_v21 = vld [vmem:[%s4501_s21 + $0x60] sm:$0xff]  ;;  %1004 = vmatprep.mubr.f32.mxu0 %v4044_v24  ;;  %1075 = vmatprep.mubr.f32.mxu1 %v4044_v24  ;;  %v715_v30 = vld [vmem:[%s4501_s21 + $0x78] sm:$0xff] }
 0x26d   : > { %v3132_v20 = vpack.c.bf16 %v713_v18, %v701_v17  ;;  %v725_v22 = vld [vmem:[%s4501_s21 + $0xc8] sm:$0xff]  ;;  %v3134_v25 = vpack.c.bf16 %v712_v21, %v700_v19  ;;  %v724_v27 = vld [vmem:[%s4501_s21 + $0xc0] sm:$0xff]  ;;  %v3164_v34 = vpack.c.bf16 %v715_v30, %v703_v29  ;;  %v702_v35 = vld [vmem:[%s4501_s21 + $0x10] sm:$0xff] }
 0x26e   : > { %v737_v23 = vld [vmem:[%s4501_s21 + $0x128] sm:$0xff]  ;;  %v736_v28 = vld [vmem:[%s4501_s21 + $0x120] sm:$0xff]  ;;  %v714_v36 = vld [vmem:[%s4501_s21 + $0x70] sm:$0xff] }
 0x26f   : > { %v3136_v26 = vpack.c.bf16 %v737_v23, %v725_v22  ;;  %3133 = vmatprep.subr.bf16.mxu0 %v3132_v20  ;;  %v749_v31 = vld [vmem:[%s4501_s21 + $0x188] sm:$0xff]  ;;  %v3138_v33 = vpack.c.bf16 %v736_v28, %v724_v27  ;;  %v748_v37 = vld [vmem:[%s4501_s21 + $0x180] sm:$0xff]  ;;  %v3166_v39 = vpack.c.bf16 %v714_v36, %v702_v35  ;;  %v727_v41 = vld [vmem:[%s4501_s21 + $0xd8] sm:$0xff]  ;;  %3165 = vmatprep.subr.bf16.mxu1 %v3164_v34 }
 0x270   : > { %v761_v32 = vld [vmem:[%s4501_s21 + $0x1e8] sm:$0xff]  ;;  %3135 = vmatpush1.bf16.msra.mxu0 %v3134_v25  ;;  %v760_v40 = vld [vmem:[%s4501_s21 + $0x1e0] sm:$0xff]  ;;  %v739_v42 = vld [vmem:[%s4501_s21 + $0x138] sm:$0xff] }
 0x271   : > { %3137 = vmatprep.subr.bf16.mxu0 %v3136_v26  ;;  %v3140_v38 = vpack.c.bf16 %v761_v32, %v749_v31  ;;  %v3168_v43 = vpack.c.bf16 %v739_v42, %v727_v41  ;;  %v773_v44 = vld [vmem:[%s4501_s21 + $0x248] sm:$0xff]  ;;  %v726_v46 = vld [vmem:[%s4501_s21 + $0xd0] sm:$0xff]  ;;  %3167 = vmatpush1.bf16.msra.mxu1 %v3166_v39  ;;  %v3142_v48 = vpack.c.bf16 %v760_v40, %v748_v37  ;;  %v772_v50 = vld [vmem:[%s4501_s21 + $0x240] sm:$0xff] }
 0x272   : > { %v785_v45 = vld [vmem:[%s4501_s21 + $0x2a8] sm:$0xff]  ;;  %v738_v47 = vld [vmem:[%s4501_s21 + $0x130] sm:$0xff]  ;;  %v751_v51 = vld [vmem:[%s4501_s21 + $0x198] sm:$0xff] }
 0x273   : > { %3169 = vmatprep.subr.bf16.mxu1 %v3168_v43  ;;  %v3170_v49 = vpack.c.bf16 %v738_v47, %v726_v46  ;;  %v763_v52 = vld [vmem:[%s4501_s21 + $0x1f8] sm:$0xff]  ;;  %v3144_v53 = vpack.c.bf16 %v785_v45, %v773_v44  ;;  %v784_v54 = vld [vmem:[%s4501_s21 + $0x2a0] sm:$0xff]  ;;  %v750_v56 = vld [vmem:[%s4501_s21 + $0x190] sm:$0xff] }
 0x274   : > { %3139 = vmatpush1.bf16.msra.mxu0 %v3138_v33  ;;  %v3172_v55 = vpack.c.bf16 %v763_v52, %v751_v51  ;;  %v762_v57 = vld [vmem:[%s4501_s21 + $0x1f0] sm:$0xff]  ;;  %v797_v58 = vld [vmem:[%s4501_s21 + $0x308] sm:$0xff]  ;;  %v775_v60 = vld [vmem:[%s4501_s21 + $0x258] sm:$0xff]  ;;  %v3146_v63 = vpack.c.bf16 %v784_v54, %v772_v50 }
 0x275   : > { %3141 = vmatprep.subr.bf16.mxu0 %v3140_v38  ;;  %v809_v59 = vld [vmem:[%s4501_s21 + $0x368] sm:$0xff]  ;;  %3171 = vmatpush1.bf16.msra.mxu1 %v3170_v49  ;;  %v3174_v61 = vpack.c.bf16 %v762_v57, %v750_v56  ;;  %v787_v62 = vld [vmem:[%s4501_s21 + $0x2b8] sm:$0xff]  ;;  %v796_v2 = vld [vmem:[%s4501_s21 + $0x300] sm:$0xff] }
 0x276   : > { %3173 = vmatprep.subr.bf16.mxu1 %v3172_v55  ;;  %v3176_v3 = vpack.c.bf16 %v787_v62, %v775_v60  ;;  %v774_v4 = vld [vmem:[%s4501_s21 + $0x250] sm:$0xff]  ;;  %v3148_v6 = vpack.c.bf16 %v809_v59, %v797_v58  ;;  %v808_v7 = vld [vmem:[%s4501_s21 + $0x360] sm:$0xff]  ;;  %v799_v8 = vld [vmem:[%s4501_s21 + $0x318] sm:$0xff] }
 0x277   : > { %v786_v5 = vld [vmem:[%s4501_s21 + $0x2b0] sm:$0xff]  ;;  %v811_v9 = vld [vmem:[%s4501_s21 + $0x378] sm:$0xff]  ;;  %v821_v10 = vld [vmem:[%s4501_s21 + $0x3c8] sm:$0xff]  ;;  %v3150_v13 = vpack.c.bf16 %v808_v7, %v796_v2 }
 0x278   : > { %3143 = vmatpush1.bf16.msra.mxu0 %v3142_v48  ;;  %v833_v11 = vld [vmem:[%s4501_s21 + $0x428] sm:$0xff]  ;;  %v3178_v12 = vpack.c.bf16 %v786_v5, %v774_v4  ;;  %v820_v14 = vld [vmem:[%s4501_s21 + $0x3c0] sm:$0xff]  ;;  %v3180_v15 = vpack.c.bf16 %v811_v9, %v799_v8  ;;  %v798_v16 = vld [vmem:[%s4501_s21 + $0x310] sm:$0xff] }
 0x279   : > { %3145 = vmatprep.subr.bf16.mxu0 %v3144_v53  ;;  %3175 = vmatpush1.bf16.msra.mxu1 %v3174_v61  ;;  %v810_v17 = vld [vmem:[%s4501_s21 + $0x370] sm:$0xff]  ;;  %v3152_v18 = vpack.c.bf16 %v833_v11, %v821_v10  ;;  %v832_v19 = vld [vmem:[%s4501_s21 + $0x420] sm:$0xff]  ;;  %v823_v20 = vld [vmem:[%s4501_s21 + $0x3d8] sm:$0xff] }
 0x27a   : > { %3177 = vmatprep.subr.bf16.mxu1 %v3176_v3  ;;  %v835_v21 = vld [vmem:[%s4501_s21 + $0x438] sm:$0xff]  ;;  %v845_v22 = vld [vmem:[%s4501_s21 + $0x488] sm:$0xff]  ;;  %v3182_v25 = vpack.c.bf16 %v810_v17, %v798_v16  ;;  %v3154_v26 = vpack.c.bf16 %v832_v19, %v820_v14  ;;  %v844_v27 = vld [vmem:[%s4501_s21 + $0x480] sm:$0xff] }
 0x27b   : > { %v857_v23 = vld [vmem:[%s4501_s21 + $0x4e8] sm:$0xff]  ;;  %v3184_v28 = vpack.c.bf16 %v835_v21, %v823_v20  ;;  %v822_v29 = vld [vmem:[%s4501_s21 + $0x3d0] sm:$0xff]  ;;  %v856_v32 = vld [vmem:[%s4501_s21 + $0x4e0] sm:$0xff] }
 0x27c   : > { %3147 = vmatpush1.bf16.msra.mxu0 %v3146_v63  ;;  %v834_v30 = vld [vmem:[%s4501_s21 + $0x430] sm:$0xff]  ;;  %v3156_v31 = vpack.c.bf16 %v857_v23, %v845_v22  ;;  %v847_v33 = vld [vmem:[%s4501_s21 + $0x498] sm:$0xff]  ;;  %v869_v35 = vld [vmem:[%s4501_s21 + $0x548] sm:$0xff]  ;;  %v3158_v38 = vpack.c.bf16 %v856_v32, %v844_v27 }
 0x27d   : > { %3149 = vmatprep.subr.bf16.mxu0 %v3148_v6  ;;  %3179 = vmatpush1.bf16.msra.mxu1 %v3178_v12  ;;  %v859_v34 = vld [vmem:[%s4501_s21 + $0x4f8] sm:$0xff]  ;;  %v881_v36 = vld [vmem:[%s4501_s21 + $0x5a8] sm:$0xff]  ;;  %v3186_v37 = vpack.c.bf16 %v834_v30, %v822_v29  ;;  %v868_v39 = vld [vmem:[%s4501_s21 + $0x540] sm:$0xff] }
 0x27e   : > { %3181 = vmatprep.subr.bf16.mxu1 %v3180_v15  ;;  %v3188_v40 = vpack.c.bf16 %v859_v34, %v847_v33  ;;  %v846_v41 = vld [vmem:[%s4501_s21 + $0x490] sm:$0xff]  ;;  %v3160_v43 = vpack.c.bf16 %v881_v36, %v869_v35  ;;  %v880_v44 = vld [vmem:[%s4501_s21 + $0x5a0] sm:$0xff]  ;;  %v871_v45 = vld [vmem:[%s4501_s21 + $0x558] sm:$0xff] }
 0x27f   : > { %v858_v42 = vld [vmem:[%s4501_s21 + $0x4f0] sm:$0xff]  ;;  %v883_v46 = vld [vmem:[%s4501_s21 + $0x5b8] sm:$0xff]  ;;  %v705_v47 = vld [vmem:[%s4501_s21 + $0x28] sm:$0xff]  ;;  %v3162_v50 = vpack.c.bf16 %v880_v44, %v868_v39 }
 0x280   : > { %3151 = vmatpush1.bf16.msra.mxu0 %v3150_v13  ;;  %v717_v48 = vld [vmem:[%s4501_s21 + $0x88] sm:$0xff]  ;;  %v3190_v49 = vpack.c.bf16 %v858_v42, %v846_v41  ;;  %v704_v51 = vld [vmem:[%s4501_s21 + $0x20] sm:$0xff]  ;;  %v3192_v52 = vpack.c.bf16 %v883_v46, %v871_v45  ;;  %v870_v53 = vld [vmem:[%s4501_s21 + $0x550] sm:$0xff] }
 0x281   : > { %3153 = vmatprep.subr.bf16.mxu0 %v3152_v18  ;;  %3183 = vmatpush1.bf16.msra.mxu1 %v3182_v25  ;;  %v882_v54 = vld [vmem:[%s4501_s21 + $0x5b0] sm:$0xff]  ;;  %v3196_v55 = vpack.c.bf16 %v717_v48, %v705_v47  ;;  %v716_v56 = vld [vmem:[%s4501_s21 + $0x80] sm:$0xff]  ;;  %v707_v57 = vld [vmem:[%s4501_s21 + $0x38] sm:$0xff] }
 0x282   : > { %3185 = vmatprep.subr.bf16.mxu1 %v3184_v28  ;;  %v719_v58 = vld [vmem:[%s4501_s21 + $0x98] sm:$0xff]  ;;  %v729_v59 = vld [vmem:[%s4501_s21 + $0xe8] sm:$0xff]  ;;  %v3194_v62 = vpack.c.bf16 %v882_v54, %v870_v53  ;;  %v3198_v63 = vpack.c.bf16 %v716_v56, %v704_v51  ;;  %v728_v2 = vld [vmem:[%s4501_s21 + $0xe0] sm:$0xff] }
 0x283   : > { %v741_v60 = vld [vmem:[%s4501_s21 + $0x148] sm:$0xff]  ;;  %v3228_v3 = vpack.c.bf16 %v719_v58, %v707_v57  ;;  %v706_v4 = vld [vmem:[%s4501_s21 + $0x30] sm:$0xff]  ;;  %v740_v7 = vld [vmem:[%s4501_s21 + $0x140] sm:$0xff] }
 0x284   : > { %3155 = vmatpush1.bf16.msra.mxu0 %v3154_v26  ;;  %v4636_v61 = vld [vmem:[%s4555_s14] sm:$0xff]  ;;  %v3200_v6 = vpack.c.bf16 %v741_v60, %v729_v59  ;;  %v731_v8 = vld [vmem:[%s4501_s21 + $0xf8] sm:$0xff]  ;;  %v3202_v13 = vpack.c.bf16 %v740_v7, %v728_v2 }
 0x285   : > { %3157 = vmatprep.subr.bf16.mxu0 %v3156_v31  ;;  %3187 = vmatpush1.bf16.msra.mxu1 %v3186_v37  ;;  %v718_v5 = vld [vmem:[%s4501_s21 + $0x90] sm:$0xff]  ;;  %v743_v9 = vld [vmem:[%s4501_s21 + $0x158] sm:$0xff]  ;;  %v753_v10 = vld [vmem:[%s4501_s21 + $0x1a8] sm:$0xff] }
 0x286   : > { %3189 = vmatprep.subr.bf16.mxu1 %v3188_v40  ;;  %v765_v11 = vld [vmem:[%s4501_s21 + $0x208] sm:$0xff]  ;;  %v3230_v12 = vpack.c.bf16 %v718_v5, %v706_v4  ;;  %v752_v14 = vld [vmem:[%s4501_s21 + $0x1a0] sm:$0xff]  ;;  %v3232_v15 = vpack.c.bf16 %v743_v9, %v731_v8  ;;  %v730_v16 = vld [vmem:[%s4501_s21 + $0xf0] sm:$0xff] }
 0x287   : > { %v742_v17 = vld [vmem:[%s4501_s21 + $0x150] sm:$0xff]  ;;  %v3204_v18 = vpack.c.bf16 %v765_v11, %v753_v10  ;;  %v764_v19 = vld [vmem:[%s4501_s21 + $0x200] sm:$0xff]  ;;  %v755_v20 = vld [vmem:[%s4501_s21 + $0x1b8] sm:$0xff] }
 0x288   : > { %3159 = vmatpush1.bf16.msra.mxu0 %v3158_v38  ;;  %v767_v21 = vld [vmem:[%s4501_s21 + $0x218] sm:$0xff]  ;;  %v777_v22 = vld [vmem:[%s4501_s21 + $0x268] sm:$0xff]  ;;  %v3234_v25 = vpack.c.bf16 %v742_v17, %v730_v16  ;;  %v3206_v26 = vpack.c.bf16 %v764_v19, %v752_v14  ;;  %v776_v27 = vld [vmem:[%s4501_s21 + $0x260] sm:$0xff] }
 0x289   : > { %3161 = vmatprep.subr.bf16.mxu0 %v3160_v43  ;;  %3191 = vmatpush1.bf16.msra.mxu1 %v3190_v49  ;;  %v789_v23 = vld [vmem:[%s4501_s21 + $0x2c8] sm:$0xff]  ;;  %v3236_v28 = vpack.c.bf16 %v767_v21, %v755_v20  ;;  %v754_v29 = vld [vmem:[%s4501_s21 + $0x1b0] sm:$0xff]  ;;  %v788_v32 = vld [vmem:[%s4501_s21 + $0x2c0] sm:$0xff] }
 0x28a   : > { %3193 = vmatprep.subr.bf16.mxu1 %v3192_v52  ;;  %v766_v30 = vld [vmem:[%s4501_s21 + $0x210] sm:$0xff]  ;;  %v3208_v31 = vpack.c.bf16 %v789_v23, %v777_v22  ;;  %v779_v33 = vld [vmem:[%s4501_s21 + $0x278] sm:$0xff]  ;;  %v801_v35 = vld [vmem:[%s4501_s21 + $0x328] sm:$0xff]  ;;  %v3210_v38 = vpack.c.bf16 %v788_v32, %v776_v27 }
 0x28b   : > { %v791_v34 = vld [vmem:[%s4501_s21 + $0x2d8] sm:$0xff]  ;;  %v813_v36 = vld [vmem:[%s4501_s21 + $0x388] sm:$0xff]  ;;  %v3238_v37 = vpack.c.bf16 %v766_v30, %v754_v29  ;;  %v800_v39 = vld [vmem:[%s4501_s21 + $0x320] sm:$0xff] }
 0x28c   : > { %3163 = vmatpush1.bf16.msra.mxu0 %v3162_v50  ;;  %v3240_v40 = vpack.c.bf16 %v791_v34, %v779_v33  ;;  %v778_v41 = vld [vmem:[%s4501_s21 + $0x270] sm:$0xff]  ;;  %v3212_v43 = vpack.c.bf16 %v813_v36, %v801_v35  ;;  %v812_v44 = vld [vmem:[%s4501_s21 + $0x380] sm:$0xff]  ;;  %v803_v45 = vld [vmem:[%s4501_s21 + $0x338] sm:$0xff] }
 0x28d   : > { %3197 = vmatprep.subr.bf16.mxu0 %v3196_v55  ;;  %3195 = vmatpush1.bf16.msra.mxu1 %v3194_v62  ;;  %v790_v42 = vld [vmem:[%s4501_s21 + $0x2d0] sm:$0xff]  ;;  %v815_v46 = vld [vmem:[%s4501_s21 + $0x398] sm:$0xff]  ;;  %v825_v47 = vld [vmem:[%s4501_s21 + $0x3e8] sm:$0xff]  ;;  %v3214_v50 = vpack.c.bf16 %v812_v44, %v800_v39 }
 0x28e   : > { %3229 = vmatprep.subr.bf16.mxu1 %v3228_v3  ;;  %v837_v48 = vld [vmem:[%s4501_s21 + $0x448] sm:$0xff]  ;;  %v3242_v49 = vpack.c.bf16 %v790_v42, %v778_v41  ;;  %v824_v51 = vld [vmem:[%s4501_s21 + $0x3e0] sm:$0xff]  ;;  %v3244_v52 = vpack.c.bf16 %v815_v46, %v803_v45  ;;  %v802_v53 = vld [vmem:[%s4501_s21 + $0x330] sm:$0xff] }
 0x28f   : > { %1005 = vmatmul.mubr.f32.vlgmr.msra.gmra.mrb[0].mxu0 %v4636_v61  ;;  %v814_v54 = vld [vmem:[%s4501_s21 + $0x390] sm:$0xff]  ;;  %v3216_v55 = vpack.c.bf16 %v837_v48, %v825_v47  ;;  %v836_v56 = vld [vmem:[%s4501_s21 + $0x440] sm:$0xff]  ;;  %v827_v57 = vld [vmem:[%s4501_s21 + $0x3f8] sm:$0xff] }
 0x290   : > { %3199 = vmatpush1.bf16.msra.mxu0 %v3198_v63  ;;  %1146 = vmatprep.mubr.f32.mxu0 %v4044_v24  ;;  %v839_v58 = vld [vmem:[%s4501_s21 + $0x458] sm:$0xff]  ;;  %v849_v59 = vld [vmem:[%s4501_s21 + $0x4a8] sm:$0xff]  ;;  %v3246_v62 = vpack.c.bf16 %v814_v54, %v802_v53  ;;  %v3218_v63 = vpack.c.bf16 %v836_v56, %v824_v51  ;;  %v848_v2 = vld [vmem:[%s4501_s21 + $0x4a0] sm:$0xff] }
 0x291   : > { %3201 = vmatprep.subr.bf16.mxu0 %v3200_v6  ;;  %1076 = vmatmul.mubr.f32.vlgmr.msra.gmra.mrb[0].mxu1 %v4636_v61  ;;  %v861_v60 = vld [vmem:[%s4501_s21 + $0x508] sm:$0xff]  ;;  %v3248_v3 = vpack.c.bf16 %v839_v58, %v827_v57  ;;  %v826_v4 = vld [vmem:[%s4501_s21 + $0x3f0] sm:$0xff]  ;;  %v860_v7 = vld [vmem:[%s4501_s21 + $0x500] sm:$0xff] }
 0x292   : > { %3231 = vmatpush1.bf16.msra.mxu1 %v3230_v12  ;;  %1217 = vmatprep.mubr.f32.mxu1 %v4044_v24  ;;  %v838_v5 = vld [vmem:[%s4501_s21 + $0x450] sm:$0xff]  ;;  %v3220_v6 = vpack.c.bf16 %v861_v60, %v849_v59  ;;  %v851_v8 = vld [vmem:[%s4501_s21 + $0x4b8] sm:$0xff]  ;;  %v873_v10 = vld [vmem:[%s4501_s21 + $0x568] sm:$0xff] }
 0x293   : > { %3233 = vmatprep.subr.bf16.mxu1 %v3232_v15  ;;  %v863_v9 = vld [vmem:[%s4501_s21 + $0x518] sm:$0xff]  ;;  %v885_v11 = vld [vmem:[%s4501_s21 + $0x5c8] sm:$0xff]  ;;  %v3250_v12 = vpack.c.bf16 %v838_v5, %v826_v4  ;;  %v872_v14 = vld [vmem:[%s4501_s21 + $0x560] sm:$0xff] }
 0x294   : > { %3203 = vmatpush1.bf16.msra.mxu0 %v3202_v13  ;;  %v3222_v13 = vpack.c.bf16 %v860_v7, %v848_v2  ;;  %v3252_v15 = vpack.c.bf16 %v863_v9, %v851_v8  ;;  %v850_v16 = vld [vmem:[%s4501_s21 + $0x4b0] sm:$0xff]  ;;  %v884_v19 = vld [vmem:[%s4501_s21 + $0x5c0] sm:$0xff]  ;;  %v875_v20 = vld [vmem:[%s4501_s21 + $0x578] sm:$0xff] }
 0x295   : > { %3205 = vmatprep.subr.bf16.mxu0 %v3204_v18  ;;  %v862_v17 = vld [vmem:[%s4501_s21 + $0x510] sm:$0xff]  ;;  %v3224_v18 = vpack.c.bf16 %v885_v11, %v873_v10  ;;  %v887_v21 = vld [vmem:[%s4501_s21 + $0x5d8] sm:$0xff]  ;;  %v709_v22 = vld [vmem:[%s4501_s21 + $0x48] sm:$0xff] }
 0x296   : > { %3235 = vmatpush1.bf16.msra.mxu1 %v3234_v25  ;;  %v721_v23 = vld [vmem:[%s4501_s21 + $0xa8] sm:$0xff]  ;;  %v3254_v25 = vpack.c.bf16 %v862_v17, %v850_v16  ;;  %v3256_v27 = vpack.c.bf16 %v887_v21, %v875_v20  ;;  %v886_v29 = vld [vmem:[%s4501_s21 + $0x5d0] sm:$0xff]  ;;  %v720_v32 = vld [vmem:[%s4501_s21 + $0xa0] sm:$0xff] }
 0x297   : > { %3237 = vmatprep.subr.bf16.mxu1 %v3236_v28  ;;  %v874_v28 = vld [vmem:[%s4501_s21 + $0x570] sm:$0xff]  ;;  %v3260_v30 = vpack.c.bf16 %v721_v23, %v709_v22  ;;  %v733_v35 = vld [vmem:[%s4501_s21 + $0x108] sm:$0xff]  ;;  %v744_v39 = vld [vmem:[%s4501_s21 + $0x160] sm:$0xff] }
 0x298   : > { %3207 = vmatpush1.bf16.msra.mxu0 %v3206_v26  ;;  %v3226_v26 = vpack.c.bf16 %v884_v19, %v872_v14  ;;  %v3258_v33 = vpack.c.bf16 %v886_v29, %v874_v28  ;;  %v745_v36 = vld [vmem:[%s4501_s21 + $0x168] sm:$0xff]  ;;  %v768_v45 = vld [vmem:[%s4501_s21 + $0x220] sm:$0xff]  ;;  %v711_v16 = vld [vmem:[%s4501_s21 + $0x58] sm:$0xff] }
 0x299   : > { %3209 = vmatprep.subr.bf16.mxu0 %v3208_v31  ;;  %v708_v31 = vld [vmem:[%s4501_s21 + $0x40] sm:$0xff]  ;;  %v757_v41 = vld [vmem:[%s4501_s21 + $0x1c8] sm:$0xff]  ;;  %v723_v17 = vld [vmem:[%s4501_s21 + $0xb8] sm:$0xff] }
 0x29a   : > { %3239 = vmatpush1.bf16.msra.mxu1 %v3238_v37  ;;  %v3262_v34 = vpack.c.bf16 %v720_v32, %v708_v31  ;;  %v3264_v37 = vpack.c.bf16 %v745_v36, %v733_v35  ;;  %v769_v42 = vld [vmem:[%s4501_s21 + $0x228] sm:$0xff]  ;;  %v792_v51 = vld [vmem:[%s4501_s21 + $0x2e0] sm:$0xff]  ;;  %v3292_v19 = vpack.c.bf16 %v723_v17, %v711_v16  ;;  %v722_v20 = vld [vmem:[%s4501_s21 + $0xb0] sm:$0xff] }
 0x29b   : > { %3241 = vmatprep.subr.bf16.mxu1 %v3240_v40  ;;  %v3268_v44 = vpack.c.bf16 %v769_v42, %v757_v41  ;;  %v781_v47 = vld [vmem:[%s4501_s21 + $0x288] sm:$0xff]  ;;  %v804_v56 = vld [vmem:[%s4501_s21 + $0x340] sm:$0xff]  ;;  %v735_v21 = vld [vmem:[%s4501_s21 + $0x118] sm:$0xff] }
 0x29c   : > { %3211 = vmatpush1.bf16.msra.mxu0 %v3210_v38  ;;  %v732_v38 = vld [vmem:[%s4501_s21 + $0x100] sm:$0xff]  ;;  %v793_v48 = vld [vmem:[%s4501_s21 + $0x2e8] sm:$0xff]  ;;  %v747_v22 = vld [vmem:[%s4501_s21 + $0x178] sm:$0xff] }
 0x29d   : > { %3213 = vmatprep.subr.bf16.mxu0 %v3212_v43  ;;  %v3266_v40 = vpack.c.bf16 %v744_v39, %v732_v38  ;;  %v756_v43 = vld [vmem:[%s4501_s21 + $0x1c0] sm:$0xff]  ;;  %v817_v53 = vld [vmem:[%s4501_s21 + $0x3a8] sm:$0xff]  ;;  %v759_v28 = vld [vmem:[%s4501_s21 + $0x1d8] sm:$0xff] }
 0x29e   : > { %3243 = vmatpush1.bf16.msra.mxu1 %v3242_v49  ;;  %v3270_v46 = vpack.c.bf16 %v768_v45, %v756_v43  ;;  %v780_v49 = vld [vmem:[%s4501_s21 + $0x280] sm:$0xff]  ;;  %v829_v58 = vld [vmem:[%s4501_s21 + $0x408] sm:$0xff]  ;;  %v771_v29 = vld [vmem:[%s4501_s21 + $0x238] sm:$0xff] }
 0x29f   : > { %3245 = vmatprep.subr.bf16.mxu1 %v3244_v52  ;;  %v805_v52 = vld [vmem:[%s4501_s21 + $0x348] sm:$0xff]  ;;  %v3274_v54 = vpack.c.bf16 %v792_v51, %v780_v49  ;;  %v816_v57 = vld [vmem:[%s4501_s21 + $0x3a0] sm:$0xff]  ;;  %v3300_v31 = vpack.c.bf16 %v771_v29, %v759_v28  ;;  %v758_v32 = vld [vmem:[%s4501_s21 + $0x1d0] sm:$0xff] }
 0x2a0   : > { %3215 = vmatpush1.bf16.msra.mxu0 %v3214_v50  ;;  %v3272_v50 = vpack.c.bf16 %v793_v48, %v781_v47  ;;  %v841_v59 = vld [vmem:[%s4501_s21 + $0x468] sm:$0xff]  ;;  %v3278_v60 = vpack.c.bf16 %v816_v57, %v804_v56  ;;  %v840_v2 = vld [vmem:[%s4501_s21 + $0x460] sm:$0xff]  ;;  %v795_v35 = vld [vmem:[%s4501_s21 + $0x2f8] sm:$0xff] }
 0x2a1   : > { %3217 = vmatprep.subr.bf16.mxu0 %v3216_v55  ;;  %v3276_v55 = vpack.c.bf16 %v817_v53, %v805_v52  ;;  %v865_v4 = vld [vmem:[%s4501_s21 + $0x528] sm:$0xff]  ;;  %v852_v7 = vld [vmem:[%s4501_s21 + $0x4c0] sm:$0xff]  ;;  %v782_v38 = vld [vmem:[%s4501_s21 + $0x290] sm:$0xff] }
 0x2a2   : > { %3247 = vmatpush1.bf16.msra.mxu1 %v3246_v62  ;;  %v3280_v62 = vpack.c.bf16 %v841_v59, %v829_v58  ;;  %v864_v8 = vld [vmem:[%s4501_s21 + $0x520] sm:$0xff]  ;;  %v877_v9 = vld [vmem:[%s4501_s21 + $0x588] sm:$0xff]  ;;  %v794_v39 = vld [vmem:[%s4501_s21 + $0x2f0] sm:$0xff] }
 0x2a3   : > { %3249 = vmatprep.subr.bf16.mxu1 %v3248_v3  ;;  %v853_v3 = vld [vmem:[%s4501_s21 + $0x4c8] sm:$0xff]  ;;  %v3286_v11 = vpack.c.bf16 %v864_v8, %v852_v7  ;;  %v888_v14 = vld [vmem:[%s4501_s21 + $0x5e0] sm:$0xff]  ;;  %v819_v41 = vld [vmem:[%s4501_s21 + $0x3b8] sm:$0xff]  ;;  %v3306_v42 = vpack.c.bf16 %v794_v39, %v782_v38  ;;  %v4775_v8 = vshrl.u32 %v651_v0, 7 }
 0x2a4   : > { %3219 = vmatpush1.bf16.msra.mxu0 %v3218_v63  ;;  %v828_v63 = vld [vmem:[%s4501_s21 + $0x400] sm:$0xff]  ;;  %v889_v10 = vld [vmem:[%s4501_s21 + $0x5e8] sm:$0xff]  ;;  %v818_v45 = vld [vmem:[%s4501_s21 + $0x3b0] sm:$0xff] }
 0x2a5   : > { %3221 = vmatprep.subr.bf16.mxu0 %v3220_v6  ;;  %v3282_v5 = vpack.c.bf16 %v840_v2, %v828_v63  ;;  %v3284_v6 = vpack.c.bf16 %v865_v4, %v853_v3  ;;  %v843_v47 = vld [vmem:[%s4501_s21 + $0x478] sm:$0xff]  ;;  %v842_v51 = vld [vmem:[%s4501_s21 + $0x470] sm:$0xff]  ;;  %v689_v16 = vld [vmem:[%s4517_s17 + $0x8] sm:$0xff] }
 0x2a6   : > { %3251 = vmatpush1.bf16.msra.mxu1 %v3250_v12  ;;  %v3288_v12 = vpack.c.bf16 %v889_v10, %v877_v9  ;;  %v855_v52 = vld [vmem:[%s4501_s21 + $0x4d8] sm:$0xff]  ;;  %v854_v56 = vld [vmem:[%s4501_s21 + $0x4d0] sm:$0xff]  ;;  %v692_v9 = vld [vmem:[%s4517_s17 + $0x20] sm:$0xff]  ;;  %v4779_v10 = vsub.s32 0, %v4775_v8 }
 0x2a7   : > { %3253 = vmatprep.subr.bf16.mxu1 %v3252_v15  ;;  %v867_v53 = vld [vmem:[%s4501_s21 + $0x538] sm:$0xff]  ;;  %v866_v57 = vld [vmem:[%s4501_s21 + $0x530] sm:$0xff] }
 0x2a8   : > { %3223 = vmatpush1.bf16.msra.mxu0 %v3222_v13  ;;  %v876_v13 = vld [vmem:[%s4501_s21 + $0x580] sm:$0xff]  ;;  %v879_v58 = vld [vmem:[%s4501_s21 + $0x598] sm:$0xff]  ;;  %v878_v63 = vld [vmem:[%s4501_s21 + $0x590] sm:$0xff] }
 0x2a9   : > { %3225 = vmatprep.subr.bf16.mxu0 %v3224_v18  ;;  %v3290_v15 = vpack.c.bf16 %v888_v14, %v876_v13  ;;  %v710_v18 = vld [vmem:[%s4501_s21 + $0x50] sm:$0xff]  ;;  %v891_v59 = vld [vmem:[%s4501_s21 + $0x5f8] sm:$0xff] }
 0x2aa   : > { %3255 = vmatpush1.bf16.msra.mxu1 %v3254_v25  ;;  %v3294_v23 = vpack.c.bf16 %v722_v20, %v710_v18  ;;  %v3296_v25 = vpack.c.bf16 %v747_v22, %v735_v21  ;;  %v890_v2 = vld [vmem:[%s4501_s21 + $0x5f0] sm:$0xff]  ;;  %v899_v22 = vrot.slane %v689_v16, %v4779_v10 }
 0x2ab   : > { %3257 = vmatprep.subr.bf16.mxu1 %v3256_v27  ;;  %v746_v27 = vld [vmem:[%s4501_s21 + $0x170] sm:$0xff]  ;;  %v3322_v3 = vpack.c.bf16 %v890_v2, %v878_v63 }
 0x2ac   : > { %3227 = vmatpush1.bf16.msra.mxu0 %v3226_v26  ;;  %v734_v26 = vld [vmem:[%s4501_s21 + $0x110] sm:$0xff] }
 0x2ad   : > { %3261 = vmatprep.subr.bf16.mxu0 %v3260_v30  ;;  %v3298_v30 = vpack.c.bf16 %v746_v27, %v734_v26  ;;  %v695_v27 = vld [vmem:[%s4517_s17 + $0x38] sm:$0xff] }
 0x2ae   : > { %3259 = vmatpush1.bf16.msra.mxu1 %v3258_v33  ;;  %v770_v33 = vld [vmem:[%s4501_s21 + $0x230] sm:$0xff] }
 0x2af   : > { %1147 = vmatmul.mubr.f32.vlgmr.msra.gmra.mrb[2].mxu0 %v4636_v61  ;;  %3293 = vmatprep.subr.bf16.mxu1 %v3292_v19  ;;  %v3302_v36 = vpack.c.bf16 %v770_v33, %v758_v32  ;;  %v923_v32 = vrot.slane %v695_v27, %v4779_v10  ;;  %v2014_v27 = vld [vmem:[%s4507_s28 + $0x88] sm:$0xff] }
 0x2b0   : > { %3263 = vmatpush1.bf16.msra.mxu0 %v3262_v34  ;;  %1288 = vmatprep.mubr.f32.mxu0 %v4044_v24  ;;  %v783_v34 = vld [vmem:[%s4501_s21 + $0x298] sm:$0xff] }
 0x2b1   : > { %1218 = vmatmul.mubr.f32.vlgmr.msra.gmra.mrb[2].mxu1 %v4636_v61  ;;  %3265 = vmatprep.subr.bf16.mxu0 %v3264_v37  ;;  %v3304_v37 = vpack.c.bf16 %v795_v35, %v783_v34 }
 0x2b2   : > { %1359 = vmatprep.mubr.f32.mxu1 %v4044_v24  ;;  %3295 = vmatpush1.bf16.msra.mxu1 %v3294_v23 }
 0x2b3   : > { %3297 = vmatprep.subr.bf16.mxu1 %v3296_v25  ;;  %v690_v25 = vld [vmem:[%s4517_s17 + $0x10] sm:$0xff] }
 0x2b4   : > { %3267 = vmatpush1.bf16.msra.mxu0 %v3266_v40  ;;  %v807_v40 = vld [vmem:[%s4501_s21 + $0x358] sm:$0xff] }
 0x2b5   : > { %3269 = vmatprep.subr.bf16.mxu0 %v3268_v44  ;;  %v3308_v43 = vpack.c.bf16 %v819_v41, %v807_v40  ;;  %v806_v44 = vld [vmem:[%s4501_s21 + $0x350] sm:$0xff] }
 0x2b6   : > { %3299 = vmatpush1.bf16.msra.mxu1 %v3298_v30  ;;  %v3310_v48 = vpack.c.bf16 %v818_v45, %v806_v44  ;;  %v903_v30 = vrot.slane %v690_v25, %v4779_v10 }
 0x2b7   : > { %3301 = vmatprep.subr.bf16.mxu1 %v3300_v31  ;;  %v691_v31 = vld [vmem:[%s4517_s17 + $0x18] sm:$0xff] }
 0x2b8   : > { %3271 = vmatpush1.bf16.msra.mxu0 %v3270_v46  ;;  %v831_v46 = vld [vmem:[%s4501_s21 + $0x418] sm:$0xff]  ;;  %v907_v34 = vrot.slane %v691_v31, %v4779_v10  ;;  %v2015_v31 = vld [vmem:[%s4507_s28 + $0x90] sm:$0xff] }
 0x2b9   : > { %3273 = vmatprep.subr.bf16.mxu0 %v3272_v50  ;;  %v3312_v49 = vpack.c.bf16 %v843_v47, %v831_v46  ;;  %v830_v50 = vld [vmem:[%s4501_s21 + $0x410] sm:$0xff] }
 0x2ba   : > { %3303 = vmatpush1.bf16.msra.mxu1 %v3302_v36 }
 0x2bb   : > { %3305 = vmatprep.subr.bf16.mxu1 %v3304_v37  ;;  %v696_v37 = vld [vmem:[%s4517_s17 + $0x40] sm:$0xff] }
 0x2bc   : > { %3275 = vmatpush1.bf16.msra.mxu0 %v3274_v54  ;;  %v3314_v54 = vpack.c.bf16 %v842_v51, %v830_v50  ;;  %v927_v38 = vrot.slane %v696_v37, %v4779_v10  ;;  %v2017_v37 = vld [vmem:[%s4507_s28 + $0xa0] sm:$0xff] }
 0x2bd   : > { %3277 = vmatprep.subr.bf16.mxu0 %v3276_v55  ;;  %v3316_v55 = vpack.c.bf16 %v867_v53, %v855_v52 }
 0x2be   : > { %3307 = vmatpush1.bf16.msra.mxu1 %v3306_v42 }
 0x2bf   : > { %3309 = vmatprep.subr.bf16.mxu1 %v3308_v43  ;;  %v2836_v43 = vld [vmem:[%s646_s15] ss:$0 sm:$0xff] }
 0x2c0   : > { %3279 = vmatpush1.bf16.msra.mxu0 %v3278_v60  ;;  %v3318_v60 = vpack.c.bf16 %v866_v57, %v854_v56 }
 0x2c1   : > { %3281 = vmatprep.subr.bf16.mxu0 %v3280_v62  ;;  %v3320_v62 = vpack.c.bf16 %v891_v59, %v879_v58 }
 0x2c2   : > { %3311 = vmatpush1.bf16.msra.mxu1 %v3310_v48 }
 0x2c3   : > { %3313 = vmatprep.subr.bf16.mxu1 %v3312_v49 }
 0x2c4   : > { %3283 = vmatpush1.bf16.msra.mxu0 %v3282_v5 }
 0x2c5   : > { %3285 = vmatprep.subr.bf16.mxu0 %v3284_v6 }
 0x2c6   : > { %3315 = vmatpush1.bf16.msra.mxu1 %v3314_v54 }
 0x2c7   : > { %3317 = vmatprep.subr.bf16.mxu1 %v3316_v55 }
 0x2c8   : > { %3287 = vmatpush1.bf16.msra.mxu0 %v3286_v11  ;;  %v4782_v11 = vld [vmem:[%s4517_s17] sm:$0xff] }
 0x2c9   : > { %3289 = vmatprep.subr.bf16.mxu0 %v3288_v12  ;;  %v911_v12 = vrot.slane %v692_v9, %v4779_v10  ;;  %v895_v13 = vrot.slane %v4782_v11, %v4779_v10 }
 0x2ca   : > { %3319 = vmatpush1.bf16.msra.mxu1 %v3318_v60 }
 0x2cb   : > { %3321 = vmatprep.subr.bf16.mxu1 %v3320_v62 }
 0x2cc   : > { %3291 = vmatpush1.bf16.msra.mxu0 %v3290_v15  ;;  %v694_v15 = vld [vmem:[%s4517_s17 + $0x30] sm:$0xff] }
 0x2cd   : > { %2987 = vmatprep.subr.mxu0 %v4044_v24  ;;  %v919_v19 = vrot.slane %v694_v15, %v4779_v10 }
 0x2ce   : > { %3323 = vmatpush1.bf16.msra.mxu1 %v3322_v3 }
 0x2cf   : > { %1289 = vmatmul.mubr.f32.vlgmr.msra.gmra.mrb[4].mxu0 %v4636_v61  ;;  %2992 = vmatprep.subr.mxu1 %v4044_v24 }
 0x2d0   : > { %2989 = vmatprep.mubr.msk.f32.mxu0 %vm4045_vm1, %v4044_v24 }
 0x2d1   : > { %1360 = vmatmul.mubr.f32.vlgmr.msra.gmra.mrb[4].mxu1 %v4636_v61  ;;  %v693_v61 = vld [vmem:[%s4517_s17 + $0x28] sm:$0xff] }
 0x2d2   : > { %2994 = vmatprep.mubr.msk.f32.mxu1 %vm4045_vm1, %v4044_v24  ;;  %v915_v0 = vrot.slane %v693_v61, %v4779_v10 }
 0x362   : > { %v1006_v4 = vpop.f32.mrb[0].mxu0 }
 0x363   : > { %v1008_v5 = vpop.f32.mrb[1].mxu0  ;;  %v1007_v21 = vadd.f32 %v1006_v4, %v895_v13 }
 0x364   : > { %v1077_v6 = vpop.f32.mrb[0].mxu1  ;;  %v1009_v29 = vadd.f32 %v1008_v5, %v899_v22 }
 0x365   : > { %v1079_v7 = vpop.f32.mrb[1].mxu1  ;;  %v1078_v33 = vadd.f32 %v1077_v6, %v903_v30  ;;  %v1998_v30 = vld [vmem:[%s4507_s28 + $0x8] sm:$0xff] }
 0x366   : > { %v1080_v36 = vadd.f32 %v1079_v7, %v907_v34 }
 0x382   : > { %v1148_v14 = vpop.f32.mrb[2].mxu0 }
 0x383   : > { %v1149_v17 = vadd.f32 %v1148_v14, %v911_v12  ;;  %v1150_v18 = vpop.f32.mrb[3].mxu0 }
 0x384   : > { %v1219_v20 = vpop.f32.mrb[2].mxu1  ;;  %v1151_v26 = vadd.f32 %v1150_v18, %v915_v0 }
 0x385   : > { %2988 = vmatpush3.xpose.msra.mxu0 %v1149_v17  ;;  %v1221_v23 = vpop.f32.mrb[3].mxu1  ;;  %v1220_v28 = vadd.f32 %v1219_v20, %v919_v19 }
 0x386   : > { %2997 = vmatprep.subr.mxu0 %v4044_v24  ;;  %v1222_v35 = vadd.f32 %v1221_v23, %v923_v32  ;;  %v2016_v32 = vld [vmem:[%s4507_s28 + $0x98] sm:$0xff] }
 0x387   : > { %v3328_v34 = vpack.c.bf16 %v2016_v32, %v2015_v31  ;;  %v2046_v31 = vld [vmem:[%s4507_s28 + $0x188] sm:$0xff] }
 0x388   : > { %2990 = vmatmul.mubr.f32.vlgmr.msra.gmra.mrb[6].mxu0 %v1007_v21 }
 0x389   : > { %2998 = vmatpush3.xpose.msra.mxu0 %v1151_v26  ;;  %2999 = vmatprep.mubr.msk.f32.mxu0 %vm4045_vm1, %v4044_v24  ;;  %v2013_v26 = vld [vmem:[%s4507_s28 + $0x80] sm:$0xff] }
 0x38a   : > { %3007 = vmatprep.subr.mxu0 %v4044_v24 }
 0x38c   : > { %3000 = vmatmul.mubr.f32.vlgmr.msra.gmra.mrb[8].mxu0 %v1009_v29  ;;  %v3324_v29 = vpack.c.bf16 %v2014_v27, %v2013_v26  ;;  %v699_v26 = vld [vmem:[%s4517_s17 + $0x58] sm:$0xff] }
 0x38d   : > { %3008 = vmatpush3.xpose.msra.mxu0 %v1220_v28  ;;  %3009 = vmatprep.mubr.msk.f32.mxu0 %vm4045_vm1, %v4044_v24  ;;  %v1997_v28 = vld [vmem:[%s4507_s28] sm:$0xff] }
 0x38e   : > { %3017 = vmatprep.subr.mxu0 %v4044_v24 }
 0x390   : > { %3010 = vmatmul.mubr.f32.vlgmr.msra.gmra.mrb[10].mxu0 %v1078_v33  ;;  %v3326_v33 = vpack.c.bf16 %v1998_v30, %v1997_v28  ;;  %v939_v30 = vrot.slane %v699_v26, %v4779_v10  ;;  %v2060_v26 = vld [vmem:[%s4507_s28 + $0x1f8] sm:$0xff] }
 0x391   : > { %3018 = vmatpush3.xpose.msra.mxu0 %v1222_v35  ;;  %3019 = vmatprep.mubr.msk.f32.mxu0 %vm4045_vm1, %v4044_v24  ;;  %v1999_v35 = vld [vmem:[%s4507_s28 + $0x10] sm:$0xff] }
 0x392   : > { %3325 = vmatprep.subr.bf16.mxu0 %v3324_v29 }
 0x394   : > { %3020 = vmatmul.mubr.f32.vlgmr.msra.gmra.mrb[12].mxu0 %v1080_v36  ;;  %v2000_v36 = vld [vmem:[%s4507_s28 + $0x18] sm:$0xff] }
 0x395   : > { %3327 = vmatpush3.bf16.msra.mxu0 %v3326_v33 }
 0x396   : > { %3329 = vmatprep.subr.bf16.mxu0 %v3328_v34  ;;  %v2030_v34 = vld [vmem:[%s4507_s28 + $0x108] sm:$0xff] }
 0x3a2   : > { %v1290_v39 = vpop.f32.mrb[4].mxu0 }
 0x3a3   : > { %v1291_v40 = vadd.f32 %v1290_v39, %v927_v38  ;;  %v4810_v41 = vpop.f32.mrb[5].mxu0  ;;  %v2018_v38 = vld [vmem:[%s4507_s28 + $0xa8] sm:$0xff]  ;;  %v3330_v39 = vpack.c.bf16 %v2000_v36, %v1999_v35  ;;  %v2047_v35 = vld [vmem:[%s4507_s28 + $0x190] sm:$0xff]  ;;  %v2048_v36 = vld [vmem:[%s4507_s28 + $0x198] sm:$0xff] }
 0x3a4   : > { %v4838_v23 = vpop.f32.mrb[4].mxu1 }
 0x3a5   : > { %2993 = vmatpush3.msra.mxu1 %v1291_v40  ;;  %v4840_v25 = vpop.f32.mrb[5].mxu1  ;;  %v3332_v40 = vpack.c.bf16 %v2018_v38, %v2017_v37  ;;  %3331 = vmatpush3.bf16.msra.mxu0 %v3330_v39  ;;  %v3360_v38 = vpack.c.bf16 %v2048_v36, %v2047_v35  ;;  %v2031_v39 = vld [vmem:[%s4507_s28 + $0x110] sm:$0xff]  ;;  %v2063_v36 = vsub.s32 1, %v4775_v8 }
 0x3a6   : > { %3002 = vmatprep.subr.mxu1 %v4044_v24  ;;  %v1364_v33 = vadd.f32 %v4840_v25, %v939_v30 }
 0x3a7   : > { %3333 = vmatprep.subr.bf16.mxu0 %v3332_v40  ;;  %v2032_v40 = vld [vmem:[%s4507_s28 + $0x118] sm:$0xff] }
 0x45b   : > { %v1432_v42 = vpop.f32.mrb[6].mxu0 }
 0x45c   : > { %v1436_v44 = vmul.f32 0.35355338, %v1432_v42  ;;  %v2991_v45 = vpop.f32.mrb[7].mxu0  ;;  %v2001_v42 = vld [vmem:[%s4507_s28 + $0x20] sm:$0xff] }
 0x45d   : > { %v2020_v45 = vld [vmem:[%s4507_s28 + $0xb8] sm:$0xff] }
 0x45e   : > { %v1443_v46 = vadd.f32 %v2836_v43, %v1436_v44  ;;  %v2019_v44 = vld [vmem:[%s4507_s28 + $0xb0] sm:$0xff] }
 0x45f   : > { %v1595_v47 = vpop.f32.mrb[8].mxu0 }
 0x460   : > { %v1599_v48 = vmul.f32 0.35355338, %v1595_v47  ;;  %v3001_v49 = vpop.f32.mrb[9].mxu0  ;;  %v1445_v50 = vsel %vm1444_vm2, %v1443_v46, -inf  ;;  %v3336_v47 = vpack.c.bf16 %v2020_v45, %v2019_v44  ;;  %v3362_v44 = vpack.c.bf16 %v2032_v40, %v2031_v39 }
 0x461   : > { %1446 = vmax.xlane.f32.xlu0 %v1445_v50  ;;  %v2004_v49 = vld [vmem:[%s4507_s28 + $0x38] sm:$0xff]  ;;  %v2021_v50 = vld [vmem:[%s4507_s28 + $0xc0] sm:$0xff] }
 0x462   : > { %v1600_v51 = vadd.f32 %v2836_v43, %v1599_v48  ;;  %v2003_v48 = vld [vmem:[%s4507_s28 + $0x30] sm:$0xff] }
 0x463   : > { %v1751_v52 = vpop.f32.mrb[10].mxu0 }
 0x464   : > { %v1755_v53 = vmul.f32 0.35355338, %v1751_v52  ;;  %v3011_v54 = vpop.f32.mrb[11].mxu0  ;;  %v1601_v55 = vsel %vm1444_vm2, %v1600_v51, -inf  ;;  %v3338_v52 = vpack.c.bf16 %v2004_v49, %v2003_v48  ;;  %v2052_v48 = vld [vmem:[%s4507_s28 + $0x1b8] sm:$0xff] }
 0x465   : > { %1602 = vmax.xlane.f32.xlu0 %v1601_v55  ;;  %v2005_v54 = vld [vmem:[%s4507_s28 + $0x40] sm:$0xff]  ;;  %v2006_v55 = vld [vmem:[%s4507_s28 + $0x48] sm:$0xff] }
 0x466   : > { %v1756_v56 = vadd.f32 %v2836_v43, %v1755_v53 }
 0x467   : > { %v1907_v57 = vpop.f32.mrb[12].mxu0 }
 0x468   : > { %v1911_v58 = vmul.f32 0.35355338, %v1907_v57  ;;  %v3021_v59 = vpop.f32.mrb[13].mxu0  ;;  %v1757_v60 = vsel %vm1444_vm2, %v1756_v56, -inf  ;;  %v2024_v57 = vld [vmem:[%s4507_s28 + $0xd8] sm:$0xff] }
 0x469   : > { %1758 = vmax.xlane.f32.xlu1 %v1757_v60  ;;  %v2007_v60 = vld [vmem:[%s4507_s28 + $0x50] sm:$0xff] }
 0x46a   : > { %v1912_v62 = vadd.f32 %v2836_v43, %v1911_v58  ;;  %v2002_v43 = vld [vmem:[%s4507_s28 + $0x28] sm:$0xff]  ;;  %v3342_v58 = vpack.c.bf16 %v2006_v55, %v2005_v54 }
 0x46b   : > { %v2054_v54 = vld [vmem:[%s4507_s28 + $0x1c8] sm:$0xff] }
 0x46c   : > { %v1913_v63 = vsel %vm1444_vm2, %v1912_v62, -inf }
 0x46d   : > { %1914 = vmax.xlane.f32.xlu1 %v1913_v63  ;;  %v2025_v63 = vld [vmem:[%s4507_s28 + $0xe0] sm:$0xff] }
 0x4ee   : > { %v1447_v2 = vpop.xlane.xlu0 %1446 }
 0x4ef   : > { %v1448_v3 = vsub.f32 %v1443_v46, %v1447_v2  ;;  %v3334_v46 = vpack.c.bf16 %v2002_v43, %v2001_v42  ;;  %v2026_v2 = vld [vmem:[%s4507_s28 + $0xe8] sm:$0xff]  ;;  %v2049_v42 = vld [vmem:[%s4507_s28 + $0x1a0] sm:$0xff] }
 0x4f0   : > { %v2050_v43 = vld [vmem:[%s4507_s28 + $0x1a8] sm:$0xff] }
 0x4f1   : > { %v1449_v4 = vmul.f32 1.442695, %v1448_v3  ;;  %3335 = vmatpush3.bf16.msra.mxu0 %v3334_v46  ;;  %v3364_v45 = vpack.c.bf16 %v2050_v43, %v2049_v42  ;;  %v2033_v46 = vld [vmem:[%s4507_s28 + $0x120] sm:$0xff] }
 0x4f2   : > { %v1603_v5 = vpop.xlane.xlu0 %1602  ;;  %3337 = vmatprep.subr.bf16.mxu0 %v3336_v47  ;;  %v2034_v47 = vld [vmem:[%s4507_s28 + $0x128] sm:$0xff] }
 0x4f3   : > { %3631 = vpow2.f32 %v1449_v4  ;;  %v1604_v6 = vsub.f32 %v1600_v51, %v1603_v5  ;;  %v2022_v51 = vld [vmem:[%s4507_s28 + $0xc8] sm:$0xff]  ;;  %v3348_v4 = vpack.c.bf16 %v2026_v2, %v2025_v63  ;;  %v2009_v5 = vld [vmem:[%s4507_s28 + $0x60] sm:$0xff]  ;;  %v3366_v49 = vpack.c.bf16 %v2034_v47, %v2033_v46  ;;  %v2055_v63 = vld [vmem:[%s4507_s28 + $0x1d0] sm:$0xff] }
 0x4f4   : > { %v3340_v53 = vpack.c.bf16 %v2022_v51, %v2021_v50  ;;  %v2035_v51 = vld [vmem:[%s4507_s28 + $0x130] sm:$0xff]  ;;  %v4046_v47 = vmov 0.0|0.0  }
 0x4f5   : > { %v1605_v7 = vmul.f32 1.442695, %v1604_v6  ;;  %3339 = vmatpush3.bf16.msra.mxu0 %v3338_v52  ;;  %v2010_v6 = vld [vmem:[%s4507_s28 + $0x68] sm:$0xff]  ;;  %v2036_v52 = vld [vmem:[%s4507_s28 + $0x138] sm:$0xff]  ;;  %v2232_v46 = vld [vmem:[%s4509_s29 + $0x10] sm:$0xff] }
 0x4f6   : > { %v1759_v9 = vpop.xlane.xlu1 %1758  ;;  %3341 = vmatprep.subr.bf16.mxu0 %v3340_v53  ;;  %v2053_v53 = vld [vmem:[%s4507_s28 + $0x1c0] sm:$0xff]  ;;  %v3370_v55 = vpack.c.bf16 %v2036_v52, %v2035_v51  ;;  %v2235_v51 = vld [vmem:[%s4509_s29 + $0x28] sm:$0xff] }
 0x4f7   : > { %3633 = vpow2.f32 %v1605_v7  ;;  %v1760_v12 = vsub.f32 %v1756_v56, %v1759_v9  ;;  %v2023_v56 = vld [vmem:[%s4507_s28 + $0xd0] sm:$0xff]  ;;  %v3350_v7 = vpack.c.bf16 %v2010_v6, %v2009_v5  ;;  %v2012_v5 = vld [vmem:[%s4507_s28 + $0x78] sm:$0xff] }
 0x4f8   : > { %v3344_v59 = vpack.c.bf16 %v2024_v57, %v2023_v56  ;;  %v3372_v56 = vpack.c.bf16 %v2054_v54, %v2053_v53  ;;  %v2037_v57 = vld [vmem:[%s4507_s28 + $0x140] sm:$0xff] }
 0x4f9   : > { %v1761_v61 = vmul.f32 1.442695, %v1760_v12  ;;  %3343 = vmatpush3.bf16.msra.mxu0 %v3342_v58  ;;  %v2038_v58 = vld [vmem:[%s4507_s28 + $0x148] sm:$0xff] }
 0x4fa   : > { %v1915_v13 = vpop.xlane.xlu1 %1914  ;;  %3345 = vmatprep.subr.bf16.mxu0 %v3344_v59  ;;  %v3374_v59 = vpack.c.bf16 %v2038_v58, %v2037_v57  ;;  %v3653_v43 = vld [vmem:[%s4555_s14] sm:$0xff] }
 0x4fb   : > { %3635 = vpow2.f32 %v1761_v61  ;;  %v1916_v14 = vsub.f32 %v1912_v62, %v1915_v13  ;;  %v2008_v62 = vld [vmem:[%s4507_s28 + $0x58] sm:$0xff]  ;;  %v697_v61 = vld [vmem:[%s4517_s17 + $0x48] sm:$0xff]  ;;  %v2236_v58 = vld [vmem:[%s4509_s29 + $0x30] sm:$0xff] }
 0x4fc   : > { %v3346_v3 = vpack.c.bf16 %v2008_v62, %v2007_v60  ;;  %v2027_v60 = vld [vmem:[%s4507_s28 + $0xf0] sm:$0xff]  ;;  %v2028_v62 = vld [vmem:[%s4507_s28 + $0xf8] sm:$0xff] }
 0x4fd   : > { %v4822_v15 = vpop.eup %3631  ;;  %v1917_v16 = vmul.f32 1.442695, %v1916_v14  ;;  %v698_v14 = vld [vmem:[%s4517_s17 + $0x50] sm:$0xff]  ;;  %v3352_v2 = vpack.c.bf16 %v2028_v62, %v2027_v60  ;;  %v2238_v62 = vld [vmem:[%s4509_s29 + $0x40] sm:$0xff] }
 0x4fe   : > { %v1451_v17 = vsel %vm1444_vm2, %v4822_v15, 0.0  ;;  %3347 = vmatpush3.bf16.msra.mxu0 %v3346_v3  ;;  %v2056_v3 = vld [vmem:[%s4507_s28 + $0x1d8] sm:$0xff] }
 0x4ff   : > { %3637 = vpow2.f32 %v1917_v16  ;;  %1452 = vadd.xlane.f32.xlu0 %v1451_v17  ;;  %3349 = vmatprep.subr.bf16.mxu0 %v3348_v4  ;;  %v931_v16 = vrot.slane %v697_v61, %v4779_v10  ;;  %v2011_v4 = vld [vmem:[%s4507_s28 + $0x70] sm:$0xff]  ;;  %v3376_v6 = vpack.c.bf16 %v2056_v3, %v2055_v63  ;;  %v2239_v63 = vld [vmem:[%s4509_s29 + $0x48] sm:$0xff] }
 0x500   : > { %v3401_v3 = vpack.c.bf16 %v2239_v63, %v2238_v62 }
 0x501   : > { %v4826_v0 = vpop.eup %3633  ;;  %v1293_v27 = vadd.f32 %v4810_v41, %v931_v16  ;;  %v2045_v41 = vld [vmem:[%s4507_s28 + $0x180] sm:$0xff] }
 0x502   : > { %v1607_v18 = vsel %vm1444_vm2, %v4826_v0, 0.0  ;;  %3351 = vmatpush3.bf16.msra.mxu0 %v3350_v7  ;;  %v3354_v7 = vpack.c.bf16 %v2012_v5, %v2011_v4  ;;  %v2241_v4 = vld [vmem:[%s4509_s29 + $0x58] sm:$0xff] }
 0x503   : > { %1608 = vadd.xlane.f32.xlu1 %v1607_v18  ;;  %v935_v18 = vrot.slane %v698_v14, %v4779_v10  ;;  %3353 = vmatprep.subr.bf16.mxu0 %v3352_v2  ;;  %v2058_v14 = vld [vmem:[%s4507_s28 + $0x1e8] sm:$0xff]  ;;  %v2240_v2 = vld [vmem:[%s4509_s29 + $0x50] sm:$0xff] }
 0x504   : > { %v3404_v5 = vpack.c.bf16 %v2241_v4, %v2240_v2 }
 0x505   : > { %v4830_v19 = vpop.eup %3635  ;;  %v1362_v29 = vadd.f32 %v4838_v23, %v935_v18  ;;  %v2029_v23 = vld [vmem:[%s4507_s28 + $0x100] sm:$0xff]  ;;  %v2042_v18 = vld [vmem:[%s4507_s28 + $0x168] sm:$0xff] }
 0x506   : > { %v1763_v20 = vsel %vm1444_vm2, %v4830_v19, 0.0  ;;  %3355 = vmatpush3.bf16.msra.mxu0 %v3354_v7  ;;  %v2243_v7 = vld [vmem:[%s4509_s29 + $0x68] sm:$0xff] }
 0x507   : > { %1764 = vadd.xlane.f32.xlu0 %v1763_v20  ;;  %3388 = vmatprep.subr.bf16.mxu0 %v4046_v47 }
 0x509   : > { %v4834_v21 = vpop.eup %3637 }
 0x50a   : > { %v1919_v22 = vsel %vm1444_vm2, %v4834_v21, 0.0 }
 0x50b   : > { %1920 = vadd.xlane.f32.xlu1 %v1919_v22 }
 0x58c   : > { %v1453_v9 = vpop.xlane.xlu0 %1452 }
 0x58d   : > { %3639 = vrcp.f32 %v1453_v9  ;;  %v2039_v9 = vld [vmem:[%s4507_s28 + $0x150] sm:$0xff] }
 0x590   : > { %v1609_v12 = vpop.xlane.xlu1 %1608 }
 0x591   : > { %3641 = vrcp.f32 %v1609_v12  ;;  %v2040_v12 = vld [vmem:[%s4507_s28 + $0x158] sm:$0xff] }
 0x592   : > { %v3378_v61 = vpack.c.bf16 %v2040_v12, %v2039_v9  ;;  %v2244_v12 = vld [vmem:[%s4509_s29 + $0x70] sm:$0xff] }
 0x594   : > { %v1765_v13 = vpop.xlane.xlu0 %1764 }
 0x595   : > { %3643 = vrcp.f32 %v1765_v13  ;;  %v2057_v13 = vld [vmem:[%s4507_s28 + $0x1e0] sm:$0xff] }
 0x596   : > { %v3380_v16 = vpack.c.bf16 %v2058_v14, %v2057_v13  ;;  %v2329_v14 = vld [vmem:[%s4515_s27] sm:$0xff] }
 0x597   : > { %v3640_v17 = vpop.eup %3639 }
 0x598   : > { %v1455_v20 = vmul.f32 %v3640_v17, %v4822_v15  ;;  %v1921_v22 = vpop.xlane.xlu1 %1920  ;;  %v2041_v17 = vld [vmem:[%s4507_s28 + $0x160] sm:$0xff] }
 0x599   : > { %3645 = vrcp.f32 %v1921_v22  ;;  %v2059_v22 = vld [vmem:[%s4507_s28 + $0x1f0] sm:$0xff] }
 0x59a   : > { %2995 = vmatmul.mubr.msk.f32.vlgmr.msra.gmra.mrb[6].mxu1 %vm1444_vm2, %v1455_v20  ;;  %v3382_v20 = vpack.c.bf16 %v2042_v18, %v2041_v17 }
 0x59b   : > { %v3642_v28 = vpop.eup %3641  ;;  %3003 = vmatpush3.msra.mxu1 %v1293_v27  ;;  %3004 = vmatprep.mubr.msk.f32.mxu1 %vm4045_vm1, %v4044_v24  ;;  %v3384_v27 = vpack.c.bf16 %v2060_v26, %v2059_v22  ;;  %v2222_v26 = vsub.s32 2, %v4775_v8 }
 0x59c   : > { %v1611_v15 = vmul.f32 %v3642_v28, %v4826_v0  ;;  %3012 = vmatprep.subr.mxu1 %v4044_v24  ;;  %v3356_v0 = vpack.c.bf16 %v2046_v31, %v2045_v41  ;;  %v2043_v28 = vld [vmem:[%s4507_s28 + $0x170] sm:$0xff] }
 0x59e   : > { %3005 = vmatmul.mubr.msk.f32.vlgmr.msra.gmra.mrb[8].mxu1 %vm1444_vm2, %v1611_v15 }
 0x59f   : > { %v3644_v32 = vpop.eup %3643  ;;  %3013 = vmatpush3.msra.mxu1 %v1362_v29  ;;  %3014 = vmatprep.mubr.msk.f32.mxu1 %vm4045_vm1, %v4044_v24  ;;  %v2044_v29 = vld [vmem:[%s4507_s28 + $0x178] sm:$0xff] }
 0x5a0   : > { %v1767_v10 = vmul.f32 %v3644_v32, %v4830_v19  ;;  %3022 = vmatprep.subr.mxu1 %v4044_v24  ;;  %v3358_v19 = vpack.c.bf16 %v2030_v34, %v2029_v23  ;;  %v3386_v30 = vpack.c.bf16 %v2044_v29, %v2043_v28  ;;  %v2223_v28 = vrot.slane %v4782_v11, %v2222_v26 }
 0x5a2   : > { %3015 = vmatmul.mubr.msk.f32.vlgmr.msra.gmra.mrb[10].mxu1 %vm1444_vm2, %v1767_v10 }
 0x5a3   : > { %v3646_v25 = vpop.eup %3645  ;;  %3023 = vmatpush3.msra.mxu1 %v1364_v33  ;;  %3024 = vmatprep.mubr.msk.f32.mxu1 %vm4045_vm1, %v4044_v24 }
 0x5a4   : > { %v1923_v37 = vmul.f32 %v3646_v25, %v4834_v21  ;;  %3357 = vmatprep.subr.bf16.mxu1 %v3356_v0  ;;  %v2051_v21 = vld [vmem:[%s4507_s28 + $0x1b0] sm:$0xff]  ;;  %s5182_s28 = sld [smem:[#allocation29_spill]] }
 0x5a5   : > { %v3368_v50 = vpack.c.bf16 %v2052_v48, %v2051_v21  ;;  %v2233_v48 = vld [vmem:[%s4509_s29 + $0x18] sm:$0xff] }
 0x5a6   : > { %3025 = vmatmul.mubr.msk.f32.vlgmr.msra.gmra.mrb[12].mxu1 %vm1444_vm2, %v1923_v37 }
 0x5a7   : > { %3359 = vmatpush3.bf16.msra.mxu1 %v3358_v19  ;;  %v2064_v19 = vrot.slane %v4782_v11, %v2063_v36  ;;  %v2336_v36 = vld [vmem:[%s4515_s27 + $0x38] sm:$0xff] }
 0x5a8   : > { %3361 = vmatprep.subr.bf16.mxu1 %v3360_v38 }
 0x5aa   : > { %p2841_p1 = scmp.ne.s32.totalorder %s5182_s28, 1 }
 0x5ab   : > { %3363 = vmatpush3.bf16.msra.mxu1 %v3362_v44  ;;  %vm4048_vm3 = vmmov (!%p2841_p1), 0  }
 0x5ac   : > { %3365 = vmatprep.subr.bf16.mxu1 %v3364_v45  ;;  %v2231_v45 = vld [vmem:[%s4509_s29 + $0x8] sm:$0xff] }
 0x5af   : > { %3367 = vmatpush3.bf16.msra.mxu1 %v3366_v49  ;;  %v3392_v49 = vpack.c.bf16 %v2233_v48, %v2232_v46  ;;  %v2344_v46 = vld [vmem:[%s4515_s27 + $0x78] sm:$0xff]  ;;  %v2248_v48 = vsub.s32 4, %v4775_v8 }
 0x5b0   : > { %3369 = vmatprep.subr.bf16.mxu1 %v3368_v50  ;;  %v2234_v50 = vld [vmem:[%s4509_s29 + $0x20] sm:$0xff] }
 0x5b1   : > { %v3395_v52 = vpack.c.bf16 %v2235_v51, %v2234_v50 }
 0x5b3   : > { %3371 = vmatpush3.bf16.msra.mxu1 %v3370_v55 }
 0x5b4   : > { %3373 = vmatprep.subr.bf16.mxu1 %v3372_v56 }
 0x5b7   : > { %3375 = vmatpush3.bf16.msra.mxu1 %v3374_v59  ;;  %v2237_v59 = vld [vmem:[%s4509_s29 + $0x38] sm:$0xff] }
 0x5b8   : > { %3377 = vmatprep.subr.bf16.mxu1 %v3376_v6  ;;  %v3398_v60 = vpack.c.bf16 %v2237_v59, %v2236_v58  ;;  %v2242_v6 = vld [vmem:[%s4509_s29 + $0x60] sm:$0xff] }
 0x5b9   : > { %v3407_v9 = vpack.c.bf16 %v2243_v7, %v2242_v6 }
 0x5bb   : > { %3379 = vmatpush3.bf16.msra.mxu1 %v3378_v61  ;;  %v2245_v61 = vld [vmem:[%s4509_s29 + $0x78] sm:$0xff] }
 0x5bc   : > { %3381 = vmatprep.subr.bf16.mxu1 %v3380_v16  ;;  %v3410_v13 = vpack.c.bf16 %v2245_v61, %v2244_v12  ;;  %v2330_v16 = vld [vmem:[%s4515_s27 + $0x8] sm:$0xff] }
 0x5bd   : > { %v3413_v17 = vpack.c.bf16 %v2330_v16, %v2329_v14 }
 0x5bf   : > { %3383 = vmatpush3.bf16.msra.mxu1 %v3382_v20 }
 0x5c0   : > { %3385 = vmatprep.subr.bf16.mxu1 %v3384_v27  ;;  %v2227_v27 = vsub.s32 3, %v4775_v8 }
 0x5c3   : > { %3387 = vmatpush3.bf16.msra.mxu1 %v3386_v30 }
 0x5c4   : > { %3412 = vmatprep.subr.bf16.mxu1 %v4046_v47 }
 0x66d   : > { %v1525_v15 = vpop.f32.mrb[6].mxu1 }
 0x66e   : > { %v2996_v41 = vpop.f32.mrb[7].mxu1 }
 0x671   : > { %v1681_v31 = vpop.f32.mrb[8].mxu1 }
 0x672   : > { %v3006_v32 = vpop.f32.mrb[9].mxu1  ;;  %2129 = vmatprep.mubr.f32.mxu0 %v1681_v31 }
 0x673   : > { %2130 = vmatmul.mubr.f32.vlgmr.msra.gmra.mrb[14].mxu0 %v1525_v15  ;;  %v2228_v15 = vrot.slane %v4782_v11, %v2227_v27  ;;  %v2331_v32 = vld [vmem:[%s4515_s27 + $0x10] sm:$0xff] }
 0x674   : > { %3059 = vmatprep.mubr.msk.f32.mxu0 %vm4045_vm1, %v4044_v24 }
 0x675   : > { %v1837_v33 = vpop.f32.mrb[10].mxu1 }
 0x676   : > { %v3016_v10 = vpop.f32.mrb[11].mxu1 }
 0x679   : > { %v1993_v0 = vpop.f32.mrb[12].mxu1 }
 0x67a   : > { %v3026_v23 = vpop.f32.mrb[13].mxu1  ;;  %2199 = vmatprep.mubr.f32.mxu1 %v1993_v0  ;;  %v2333_v0 = vld [vmem:[%s4515_s27 + $0x20] sm:$0xff] }
 0x67b   : > { %2200 = vmatmul.mubr.f32.vlgmr.msra.gmra.mrb[14].mxu1 %v1837_v33  ;;  %v2332_v33 = vld [vmem:[%s4515_s27 + $0x18] sm:$0xff]  ;;  %v2334_v23 = vld [vmem:[%s4515_s27 + $0x28] sm:$0xff] }
 0x67c   : > { %3094 = vmatprep.mubr.msk.f32.mxu1 %vm4045_vm1, %v4044_v24  ;;  %v2230_v24 = vld [vmem:[%s4509_s29] sm:$0xff]  ;;  %3414 = vmatpush3.bf16.msra.mxu1 %v3413_v17  ;;  %v3416_v10 = vpack.c.bf16 %v2332_v33, %v2331_v32  ;;  %v2434_v17 = vsub.s32 6, %v4775_v8  ;;  %v2450_v32 = vld [vmem:[#allocation13 + $0x18] sm:$0xff] (!%p2841_p1) }
 0x67d   : > { %v3389_v21 = vpack.c.bf16 %v2231_v45, %v2230_v24  ;;  %3415 = vmatprep.subr.bf16.mxu1 %v4046_v47  ;;  %v2343_v45 = vld [vmem:[%s4515_s27 + $0x70] sm:$0xff] }
 0x67f   : > { %3390 = vmatpush3.bf16.msra.mxu0 %v3389_v21  ;;  %v3434_v21 = vpack.c.bf16 %v2344_v46, %v2343_v45  ;;  %v2842_v46 = vld [vmem:[#allocation14] ss:$0 sm:$0xff] (!%p2841_p1) }
 0x680   : > { %3391 = vmatprep.subr.bf16.mxu0 %v4046_v47  ;;  %3417 = vmatpush3.bf16.msra.mxu1 %v3416_v10  ;;  %v2452_v10 = vld [vmem:[#allocation13 + $0x28] sm:$0xff] (!%p2841_p1) }
 0x681   : > { %3418 = vmatprep.subr.bf16.mxu1 %v4046_v47 }
 0x683   : > { %3393 = vmatpush3.bf16.msra.mxu0 %v3392_v49  ;;  %v2249_v49 = vrot.slane %v4782_v11, %v2248_v48 }
 0x684   : > { %3394 = vmatprep.subr.bf16.mxu0 %v4046_v47 }
 0x687   : > { %3396 = vmatpush3.bf16.msra.mxu0 %v3395_v52 }
 0x688   : > { %3397 = vmatprep.subr.bf16.mxu0 %v4046_v47 }
 0x68b   : > { %3399 = vmatpush3.bf16.msra.mxu0 %v3398_v60 }
 0x68c   : > { %3400 = vmatprep.subr.bf16.mxu0 %v4046_v47 }
 0x68f   : > { %3402 = vmatpush3.bf16.msra.mxu0 %v3401_v3 }
 0x690   : > { %3403 = vmatprep.subr.bf16.mxu0 %v4046_v47 }
 0x693   : > { %3405 = vmatpush3.bf16.msra.mxu0 %v3404_v5 }
 0x694   : > { %3406 = vmatprep.subr.bf16.mxu0 %v4046_v47 }
 0x697   : > { %3408 = vmatpush3.bf16.msra.mxu0 %v3407_v9 }
 0x698   : > { %3409 = vmatprep.subr.bf16.mxu0 %v4046_v47 }
 0x69b   : > { %3411 = vmatpush3.bf16.msra.mxu0 %v3410_v13 }
 0x746   : > { %v2898_v34 = vpop.f32.mrb[14].mxu0 }
 0x747   : > { %v2899_v35 = vpop.f32.mrb[15].mxu0 }
 0x748   : > { %v2900_v25 = vadd.f32 %v2899_v35, %v2898_v34  ;;  %v3419_v34 = vpack.c.bf16 %v2334_v23, %v2333_v0  ;;  %v2335_v35 = vld [vmem:[%s4515_s27 + $0x30] sm:$0xff] }
 0x749   : > { %v2453_v23 = vld [vmem:[#allocation13 + $0x30] sm:$0xff] (!%p2841_p1) }
 0x74a   : > { %v2132_v39 = vadd.f32 %v2900_v25, %v2064_v19  ;;  %3420 = vmatpush3.bf16.msra.mxu1 %v3419_v34  ;;  %v3422_v25 = vpack.c.bf16 %v2336_v36, %v2335_v35  ;;  %v2337_v19 = vld [vmem:[%s4515_s27 + $0x40] sm:$0xff]  ;;  %v2454_v34 = vld [vmem:[#allocation13 + $0x38] sm:$0xff] (!%p2841_p1) }
 0x74b   : > { %3421 = vmatprep.subr.bf16.mxu1 %v4046_v47  ;;  %v3446_v35 = vpack.c.bf16 (!%p2841_p1), %v2454_v34, %v2453_v23  ;;  %v2455_v36 = vld [vmem:[#allocation13 + $0x40] sm:$0xff] (!%p2841_p1) }
 0x74e   : > { %v2933_v37 = vpop.f32.mrb[14].mxu1  ;;  %3423 = vmatpush3.bf16.msra.mxu1 %v3422_v25  ;;  %v2456_v25 = vld [vmem:[#allocation13 + $0x48] sm:$0xff] (!%p2841_p1) }
 0x74f   : > { %v2934_v38 = vpop.f32.mrb[15].mxu1  ;;  %3424 = vmatprep.subr.bf16.mxu1 %v4046_v47 }
 0x750   : > { %v2935_v40 = vadd.f32 %v2934_v38, %v2933_v37  ;;  %v2338_v37 = vld [vmem:[%s4515_s27 + $0x48] sm:$0xff] }
 0x751   : > { %v3425_v38 = vpack.c.bf16 %v2338_v37, %v2337_v19  ;;  %v3449_v19 = vpack.c.bf16 (!%p2841_p1), %v2456_v25, %v2455_v36  ;;  %v2457_v37 = vld [vmem:[#allocation13 + $0x50] sm:$0xff] (!%p2841_p1) }
 0x752   : > { %v2202_v42 = vadd.f32 %v2935_v40, %v2132_v39  ;;  %v2339_v39 = vld [vmem:[%s4515_s27 + $0x50] sm:$0xff]  ;;  %v2340_v40 = vld [vmem:[%s4515_s27 + $0x58] sm:$0xff] }
 0x753   : > { %3426 = vmatpush3.bf16.msra.mxu1 %v3425_v38  ;;  %v2458_v38 = vld [vmem:[#allocation13 + $0x58] sm:$0xff] (!%p2841_p1) }
 0x754   : > { %v2205_v44 = vadd.f32 %v3653_v43, %v2202_v42  ;;  %v3428_v42 = vpack.c.bf16 %v2340_v40, %v2339_v39  ;;  %3427 = vmatprep.subr.bf16.mxu1 %v4046_v47  ;;  %v2341_v43 = vld [vmem:[%s4515_s27 + $0x60] sm:$0xff]  ;;  %v3452_v39 = vpack.c.bf16 (!%p2841_p1), %v2458_v38, %v2457_v37 }
 0x755   : > { %v2459_v40 = vld [vmem:[#allocation13 + $0x60] sm:$0xff] (!%p2841_p1) }
 0x756   : > { %2206 = vadd.xlane.f32.xlu0 %v2205_v44 }
 0x757   : > { %3429 = vmatpush3.bf16.msra.mxu1 %v3428_v42  ;;  %v2460_v42 = vld [vmem:[#allocation13 + $0x68] sm:$0xff] (!%p2841_p1) }
 0x758   : > { %3430 = vmatprep.subr.bf16.mxu1 %v4046_v47 }
 0x7e3   : > { %v2207_v53 = vpop.xlane.xlu0 %2206 }
 0x7e4   : > { %v2208_v54 = vmul.f32 0.03125, %v2207_v53 }
 0x7e6   : > { %v2209_v55 = vsub.f32 %v2205_v44, %v2208_v54  ;;  %v2342_v44 = vld [vmem:[%s4515_s27 + $0x68] sm:$0xff] }
 0x7e7   : > { %v3431_v24 = vpack.c.bf16 %v2342_v44, %v2341_v43  ;;  %v3455_v43 = vpack.c.bf16 (!%p2841_p1), %v2460_v42, %v2459_v40  ;;  %v2461_v44 = vld [vmem:[#allocation13 + $0x70] sm:$0xff] (!%p2841_p1) }
 0x7e8   : > { %v2212_v56 = vsel %vm653_vm0, %v2209_v55, 0.0 }
 0x7e9   : > { %v2213_v57 = vmul.f32 %v2212_v56, %v2212_v56  ;;  %3432 = vmatpush3.bf16.msra.mxu1 %v3431_v24  ;;  %v2462_v24 = vld [vmem:[#allocation13 + $0x78] sm:$0xff] (!%p2841_p1) }
 0x7ea   : > { %3433 = vmatprep.subr.bf16.mxu1 %v4046_v47  ;;  %v2347_v47 = vsub.s32 5, %v4775_v8  ;;  %v3458_v45 = vpack.c.bf16 (!%p2841_p1), %v2462_v24, %v2461_v44 }
 0x7eb   : > { %2214 = vadd.xlane.f32.xlu1 %v2213_v57 }
 0x7ec   : > { %v2348_v63 = vrot.slane %v4782_v11, %v2347_v47 }
 0x7ed   : > { %3435 = vmatpush3.bf16.msra.mxu1 %v3434_v21 }
 0x878   : > { %v2215_v18 = vpop.xlane.xlu1 %2214 }
 0x879   : > { %v2216_v20 = vmul.f32 0.03125, %v2215_v18  ;;  %v2439_v18 = vsub.s32 7, %v4775_v8  ;;  %v4049_v8 = vmov (!%p2841_p1), 0.0  }
 0x87b   : > { %v2217_v22 = vadd.f32 1e-05, %v2216_v20  ;;  %v2435_v20 = vrot.slane %v4782_v11, %v2434_v17  ;;  %v2440_v26 = vrot.slane %v4782_v11, %v2439_v18  ;;  %v2451_v11 = vld [vmem:[#allocation13 + $0x20] sm:$0xff] (!%p2841_p1) }
 0x87c   : > { %v3443_v0 = vpack.c.bf16 (!%p2841_p1), %v2452_v10, %v2451_v11 }
 0x87d   : > { %3647 = vrsqrt.f32 %v2217_v22 }
 0x887   : > { %v3648_v29 = vpop.eup %3647 }
 0x888   : > { %v2219_v30 = vmul.f32 %v3648_v29, %v2209_v55  ;;  %v2447_v29 = vld [vmem:[#allocation13] sm:$0xff] (!%p2841_p1) }
 0x88a   : > { %v2224_v41 = vmul.f32 %v2223_v28, %v2219_v30  ;;  %v2448_v30 = vld [vmem:[#allocation13 + $0x8] sm:$0xff] (!%p2841_p1) }
 0x88c   : > { %v2229_v31 = vadd.f32 %v2228_v15, %v2224_v41  ;;  %v2449_v15 = vld [vmem:[#allocation13 + $0x10] sm:$0xff] (!%p2841_p1)  ;;  %v4047_v41 = vmov (!%p2841_p1), 0.0|0.0  }
 0x88d   : > { %3436 = vmatprep.subr.bf16.mxu0 (!%p2841_p1), %v4047_v41  ;;  %v3440_v33 = vpack.c.bf16 (!%p2841_p1), %v2450_v32, %v2449_v15 }
 0x88e   : > { %3060 = vmatmul.mubr.f32.vlgmr.msra.gmra.mrb[16].mxu0 %v2229_v31 }
 0x88f   : > { %3129 = vmatprep.mubr.msk.f32.mxu0 (!%p2841_p1), %vm4048_vm3, %v4049_v8 }
 0x961   : > { %v2316_v50 = vpop.f32.mrb[16].mxu0 }
 0x962   : > { %v2317_v51 = vadd.f32 %v2316_v50, %v2249_v49  ;;  %v3061_v52 = vpop.f32.mrb[17].mxu0 }
 0x964   : > { %v2321_v53 = vmul.f32 0.044715, %v2317_v51  ;;  %v2320_v59 = vmul.f32 0.5, %v2317_v51 }
 0x966   : > { %v2322_v54 = vmul.f32 %v2321_v53, %v2317_v51 }
 0x968   : > { %v2323_v55 = vmul.f32 %v2322_v54, %v2317_v51 }
 0x96a   : > { %v2324_v56 = vadd.f32 %v2323_v55, %v2317_v51 }
 0x96c   : > { %v2325_v57 = vmul.f32 0.7978846, %v2324_v56 }
 0x96e   : > { %3649 = vtanh.f32 %v2325_v57 }
 0x978   : > { %v3650_v58 = vpop.eup %3649 }
 0x979   : > { %v2327_v60 = vadd.f32 1.0, %v3650_v58 }
 0x97b   : > { %v2328_v62 = vmul.f32 %v2327_v60, %v2320_v59 }
 0x97d   : > { %3095 = vmatmul.mubr.f32.vlgmr.msra.gmra.mrb[16].mxu1 %v2328_v62 }
 0xa50   : > { %v2415_v2 = vpop.f32.mrb[16].mxu1 }
 0xa51   : > { %v2416_v3 = vadd.f32 %v2415_v2, %v2348_v63  ;;  %v3096_v4 = vpop.f32.mrb[17].mxu1 }
 0xa53   : > { %v2419_v5 = vadd.f32 %v2416_v3, %v2229_v31  ;;  %v3437_v31 = vpack.c.bf16 (!%p2841_p1), %v2448_v30, %v2447_v29 }
 0xa55   : > { %2420 = vadd.xlane.f32.xlu0 %v2419_v5  ;;  %3438 = vmatpush3.bf16.msra.mxu0 (!%p2841_p1), %v3437_v31 }
 0xa56   : > { %3439 = vmatprep.subr.bf16.mxu0 (!%p2841_p1), %v4047_v41 }
 0xa59   : > { %3441 = vmatpush3.bf16.msra.mxu0 (!%p2841_p1), %v3440_v33 }
 0xa5a   : > { %3442 = vmatprep.subr.bf16.mxu0 (!%p2841_p1), %v4047_v41 }
 0xa5d   : > { %3444 = vmatpush3.bf16.msra.mxu0 (!%p2841_p1), %v3443_v0 }
 0xa5e   : > { %3445 = vmatprep.subr.bf16.mxu0 (!%p2841_p1), %v4047_v41 }
 0xa61   : > { %3447 = vmatpush3.bf16.msra.mxu0 (!%p2841_p1), %v3446_v35 }
 0xa62   : > { %3448 = vmatprep.subr.bf16.mxu0 (!%p2841_p1), %v4047_v41 }
 0xa65   : > { %3450 = vmatpush3.bf16.msra.mxu0 (!%p2841_p1), %v3449_v19 }
 0xa66   : > { %3451 = vmatprep.subr.bf16.mxu0 (!%p2841_p1), %v4047_v41 }
 0xa69   : > { %3453 = vmatpush3.bf16.msra.mxu0 (!%p2841_p1), %v3452_v39 }
 0xa6a   : > { %3454 = vmatprep.subr.bf16.mxu0 (!%p2841_p1), %v4047_v41 }
 0xa6d   : > { %3456 = vmatpush3.bf16.msra.mxu0 (!%p2841_p1), %v3455_v43 }
 0xa6e   : > { %3457 = vmatprep.subr.bf16.mxu0 (!%p2841_p1), %v4047_v41 }
 0xa71   : > { %3459 = vmatpush3.bf16.msra.mxu0 (!%p2841_p1), %v3458_v45 }
 0xae2   : > { %v2421_v6 = vpop.xlane.xlu0 %2420 }
 0xae3   : > { %v2422_v7 = vmul.f32 0.03125, %v2421_v6 }
 0xae5   : > { %v2423_v9 = vsub.f32 %v2419_v5, %v2422_v7 }
 0xae7   : > { %v2424_v12 = vsel %vm653_vm0, %v2423_v9, 0.0 }
 0xae8   : > { %v2425_v61 = vmul.f32 %v2424_v12, %v2424_v12 }
 0xaea   : > { %2426 = vadd.xlane.f32.xlu1 %v2425_v61 }
 0xb77   : > { %v2427_v13 = vpop.xlane.xlu1 %2426 }
 0xb78   : > { %v2428_v14 = vmul.f32 0.03125, %v2427_v13 }
 0xb7a   : > { %v2429_v16 = vadd.f32 1e-05, %v2428_v14 }
 0xb7c   : > { %3651 = vrsqrt.f32 %v2429_v16 }
 0xb86   : > { %v3652_v22 = vpop.eup %3651 }
 0xb87   : > { %v2431_v27 = vmul.f32 %v3652_v22, %v2423_v9  ;;  %2446 = sbr.rel (%p2841_p1) target bundleno = 3172 (0xc64), region = 100 }
 0xb89   : > { %v2436_v28 = vmul.f32 %v2435_v20, %v2431_v27 }
 0xb8b   : > { %v2441_v1 = vadd.f32 %v2440_v26, %v2436_v28 }
 0xb8d   : > { %2442 = vst [vmem:[%s4555_s14] sm:$0xff] %v2441_v1  ;;  %3130 = vmatmul.mubr.f32.vlgmr.msra.gmra.mrb[0].mxu0 (!%p2841_p1), %v2441_v1 }
 0xc60   : > { %v2536_v21 = vpop.f32.mrb[0].mxu0 }
 0xc61   : > { %v2537_v48 = vadd.f32 %v2842_v46, %v2536_v21  ;;  %v3131_v49 = vpop.f32.mrb[1].mxu0 }
 0xc63   : > { %2540 = vst [vmem:[%s4553_s10] sm:$0xff] %v2537_v48 }
 0xc64 PF: > { %s5183_s29 = sld [smem:[#allocation30_spill]]  ;;  %s5185_s17 = sld [smem:[#allocation35_spill]] }
 0xc65   : > { %s5186_s8 = sld [smem:[#allocation46_spill]]  ;;  %s2559_s19 = sshll.u32 %s4555_s14, 4  ;;  %s2560_s19 = int_to_ptr.vmem [resolvable:$true] %s2559_s19 }
 0xc66   : > { %s2542_s15 = scalar_lea.sflag [#allocation4], %s631_s30  ;;  %s3888_s13 = scalar_lea.vmem %s2560_s19, 128 }
 0xc67   : > { %p3889_p7 = scmp.ne.s32.totalorder %s2560_s19, %s3888_s13  ;;  %s4050_s11 = smov [#allocation16]  }
 0xc68   : > { %s3892_s0 = sshll.u32 %s4050_s11, 4  ;;  %s3893_s0 = int_to_ptr.vmem [resolvable:$false] %s3892_s0 }
 0xc69   : > { %s3894_s1 = scalar_lea.vmem %s3893_s0, 256  ;;  %p3895_p10 = scmp.lt.s32.totalorder %s2560_s19, %s3893_s0 }
 0xc6a   : > { %s2844_s26 = sshll.u32 %s5183_s29, 7  ;;  %p5187_p6 = scmp.ne.s32.totalorder %s5185_s17, 0 }
 0xc6b   : > { %s5009_s22 = scalar_lea.hbm %s5186_s8, %s2844_s26  ;;  %p3896_p9 = scmp.lt.s32.totalorder %s3894_s1, %s3888_s13 }
 0xc6c   : > { %p3890_p12 = pnand %p3889_p7, %p5187_p6 }
 0xc6d   : > { %p3897_p0 = por %p3896_p9, %p3895_p10 }
 0xc6e   : > { %p3891_p4 = pneg %p3890_p12 }
 0xc70   : > { %p3898_p13 = pnand %p3897_p0, %p3891_p4 }
 0xc72   : > { %3901 = shalt.err (!%p3898_p13)
}
 0xc73   : > { %s3902_s30 = scalar_lea.hbm %s5009_s22, 128  ;;  %s3906_s20 = scalar_lea.hbm %s5186_s8, 256 }
 0xc74   : > { %p3903_p8 = scmp.ne.s32.totalorder %s5009_s22, %s3902_s30  ;;  %p3907_p3 = scmp.lt.u32.totalorder %s5009_s22, %s5186_s8 }
 0xc75   : > { %p3908_p2 = scmp.lt.u32.totalorder %s3906_s20, %s3902_s30  ;;  %p3910_p7 = scmp.lt.u32.totalorder %s3902_s30, %s5009_s22 }
 0xc76   : > { %p3904_p5 = pnand %p3903_p8, %p5187_p6 }
 0xc77   : > { %p3909_p1 = por %p3908_p2, %p3907_p3 }
 0xc78   : > { %p3905_p11 = pneg %p3904_p5 }
 0xc79   : > { %p3911_p12 = por %p3910_p7, %p3909_p1 }
 0xc7b   : > { %p3912_p4 = pnand %p3911_p12, %p3905_p11 }
 0xc7d   : > { %3915 = shalt.err (!%p3912_p4)
}
 0xc7e   : > { %3488 = dma.vmem_to_hbm [thread:$0]  (%p5187_p6), %s2560_s19, 128, %s5009_s22, %s2542_s15  }
 0xc7f PF: > { %s5188_s23 = sld [smem:[#allocation32_spill]]  ;;  %s5189_s21 = sld [smem:[#allocation24_spill]] }
 0xc80   : > { %s5190_s3 = sld [smem:[#allocation36_spill]] }
 0xc85   : > { %p3527_p10 = scmp.ge.s32.totalorder %s5188_s23, 2  ;;  %s2574_s24 = sand.u32 1, %s5189_s21  }
 0xc86   : > { %p5191_p9 = scmp.ne.s32.totalorder %s5190_s3, 0  ;;  %s2575_s28 = scalar_lea.sflag [#allocation4], %s2574_s24 }
 0xc88   : > { %p3517_p0 = pnand %p3527_p10, %p5191_p9 }
 0xc8a   : > { %3985 = dma.done.wait (!%p3517_p0), %s2575_s28, 128  }
 0xc8b   : > { %3987 = vsyncadd (!%p3517_p0), %s2575_s28, 4294967168  ;;  %s36_s27 = sadd.s32 1, %s5188_s23   ;;  %s5192_s17 = sld [smem:[#allocation25_spill]] }
 0xc8c   : > { %p33_p13 = scmp.ge.s32.totalorder %s36_s27, 6   ;;  %s5193_s18 = sld [smem:[#allocation26_spill]] }
 0xc8d   : > { %s5194_s19 = sld [smem:[#allocation40_spill]]  ;;  %s5195_s20 = sld [smem:[#allocation27_spill]] }
 0xc8e   : > { %s5196_s21 = sld [smem:[#allocation28_spill]]  ;;  %s5197_s22 = sld [smem:[#allocation39_spill]] }
 0xc8f   : > { %s5198_s24 = sld [smem:[#allocation31_spill]]  ;;  %s5199_s29 = sld [smem:[#allocation37_spill]] }
 0xc90   : > { %s5200_s26 = sld [smem:[#allocation38_spill]]  ;;  %s5201_s23 = smov %s4022_s25 }
 0xc91   :  { %35 = sbr.rel (!%p33_p13) target bundleno = 23 (0x17), region = 192 }
 0xc95   : > { %s5202_s25 = smov %s5199_s29 }
 0xc98   :  { %2587 = vsyncpa [#allocation3], 1 }
 0xc99   :  { %2589 = vsyncpa [#allocation3 + $0x1], 1 }
 0xc9a   :  { %2590 = vsyncpa [#allocation6], 1 }
 0xc9b   :  { %2592 = vsyncpa [#allocation6 + $0x1], 1 }
 0xc9c   :  { %2593 = vsyncpa [#allocation9], 1 }
 0xc9d   :  { %2595 = vsyncpa [#allocation9 + $0x1], 1 }
 0xc9e   :  { %2596 = vsyncpa [#allocation12], 1 }
 0xc9f   :  { %2598 = vsyncpa [#allocation12 + $0x1], 1 }
 0xca0   :  { %2599 = vsyncpa [#allocation15], 1 }
 0xca1   :  { %2600 = vsyncpa [#allocation4], 1 }
 0xca2   :  { %2602 = vsyncpa [#allocation4 + $0x1], 1 }

</bundles_post_ra>
